<compile_context>
chip_gen: v6e
topology: v6e:2x2x1
jax: 0.10.0
libtpu: 0.0.40
codegen_flags: <defaults>
</compile_context>

<pallas_src>
import functools
import math

import jax
import jax.numpy as jnp
from jax.experimental import pallas as pl
from jax.experimental.pallas import tpu as pltpu


def _pred_head_kernel(H, W, x_ref, w_ref, b_ref, o_ref):
    # x_ref : (1, (H+2)*(W+2), Cin)  bf16  zero-padded, spatially flattened image
    # w_ref : (9, Cin, Cout_pad)     bf16  per-tap fused loc+cls weights (resident)
    # b_ref : (1, Cout_pad)          f32   fused bias (resident)
    # o_ref : (1, L, Cout_pad)       f32,  L = (H-1)*(W+2) + W   (lane-dense)
    Wp = W + 2
    L = o_ref.shape[1]
    Cp = o_ref.shape[2]

    acc = jnp.broadcast_to(b_ref[...], (L, Cp))          # start from the bias
    for ky in range(3):                                   # statically unrolled
        for kx in range(3):
            t = ky * 3 + kx
            s = ky * Wp + kx                              # static window start
            acc = acc + jnp.dot(x_ref[0, s:s + L, :], w_ref[t],
                                preferred_element_type=jnp.float32)
    o_ref[0] = acc


def _torch_w_to_taps(w_loc, w_cl, cout_pad):
    # torch conv weights (Cout, Cin, 3, 3) -> (9, Cin, Cout_pad), tap = ky*3+kx,
    # loc output channels first (lanes 0..n_loc-1), then cls, then zero pad.
    w = jnp.concatenate([jnp.transpose(w_loc, (2, 3, 1, 0)),
                         jnp.transpose(w_cl, (2, 3, 1, 0))], axis=-1)   # (3,3,Cin,Cout)
    cout = w.shape[-1]
    cin = w.shape[2]
    w = jnp.pad(w, ((0, 0), (0, 0), (0, 0), (0, cout_pad - cout)))
    return w.astype(jnp.bfloat16).reshape(9, cin, cout_pad)


def _prediction_convolutions_impl(x_nchw, w_loc, b_loc, w_cl, b_cl, n_classes):
    """Forward pass of PredictionConvolutions.

    x_nchw : (N, 512, H, W) float32 (PyTorch NCHW convention)
    returns (locs, classes_scores) = (N, H*W*9, 4), (N, H*W*9, n_classes)
    """
    N, Cin, H, W = x_nchw.shape
    n_loc = w_loc.shape[0]                     # 9 * 4
    n_cl = w_cl.shape[0]                       # 9 * n_classes
    Cout = n_loc + n_cl
    Cout_pad = pl.cdiv(Cout, 128) * 128        # lane-dense output width (=128)
    Wp = W + 2
    P = (H + 2) * Wp                           # padded, flattened spatial extent
    L = (H - 1) * Wp + W                       # rows touched by every tap window

    # --- pre-kernel relayout: cast to bf16 FIRST, then NCHW->NHWC, pad=1,
    #     flatten the padded spatial dims (free reshape). Fuses under jit.
    x = jnp.transpose(x_nchw.astype(jnp.bfloat16), (0, 2, 3, 1))      # NHWC bf16
    x = jnp.pad(x, ((0, 0), (1, 1), (1, 1), (0, 0)))                  # (N,H+2,W+2,Cin)
    x = x.reshape(N, P, Cin)

    # --- fused, lane-padded per-tap weights / bias for both heads.
    w_taps = _torch_w_to_taps(w_loc, w_cl, Cout_pad)                  # (9,Cin,128) bf16
    b = jnp.pad(jnp.concatenate([b_loc, b_cl]),
                (0, Cout_pad - Cout)).astype(jnp.float32)[None, :]    # (1,128) f32

    kernel = functools.partial(_pred_head_kernel, H, W)
    cost = pl.CostEstimate(
        flops=2 * N * 9 * L * Cin * Cout_pad,
        transcendentals=0,
        bytes_accessed=(N * P * Cin * 2            # bf16 activation
                        + 9 * Cin * Cout_pad * 2   # bf16 weights (once)
                        + Cout_pad * 4             # bias
                        + N * L * Cout_pad * 4))   # f32 output

    out = pl.pallas_call(
        kernel,
        out_shape=jax.ShapeDtypeStruct((N, L, Cout_pad), jnp.float32),
        grid_spec=pltpu.PrefetchScalarGridSpec(
            num_scalar_prefetch=0,
            grid=(N,),                                    # one image per step
            in_specs=[
                pl.BlockSpec((1, P, Cin), lambda n: (n, 0, 0)),        # advances
                pl.BlockSpec((9, Cin, Cout_pad), lambda n: (0, 0, 0)),  # resident
                pl.BlockSpec((1, Cout_pad), lambda n: (0, 0)),          # resident
            ],
            out_specs=pl.BlockSpec((1, L, Cout_pad), lambda n: (n, 0, 0)),
        ),
        compiler_params=pltpu.CompilerParams(
            dimension_semantics=("parallel",)),           # pipelining + 2 TCs on v7x
        cost_estimate=cost,
    )(x, w_taps, b)

    # Drop the per-row pad-column junk: (N, L, C) -> (N, H, W+2, C)[:, :, :W, :].
    # Tiny contiguous post-kernel slice (pad 2 rows so the reshape is exact).
    out = jnp.pad(out, ((0, 0), (0, H * Wp - L), (0, 0)))
    out = out.reshape(N, H, Wp, Cout_pad)[:, :, :W, :]                # (N,H,W,128)

    # Row order is (n, h, w)-major and channel order is [loc | cls], so these
    # reshapes reproduce PyTorch's permute(0,2,3,1).contiguous().view(N,-1,k).
    # TODO(synk): emit two lane-padded output slabs from the kernel to make the
    # lane split below a from-lane-0 narrow (minor; grows linearly with batch).
    locs = out[..., :n_loc].reshape(N, -1, 4)
    classes_scores = out[..., n_loc:Cout].reshape(N, -1, n_classes)
    return locs, classes_scores


prediction_convolutions = jax.jit(_prediction_convolutions_impl,
                                  static_argnums=(5,))


def _xavier_uniform(key, shape):
    # shape = (Cout, Cin, kh, kw), gain = 1 (matches nn.init.xavier_uniform_)
    fan_in = shape[1] * shape[2] * shape[3]
    fan_out = shape[0] * shape[2] * shape[3]
    a = math.sqrt(6.0 / (fan_in + fan_out))
    return jax.random.uniform(key, shape, jnp.float32, -a, a)


def _reference(x_nchw, w_loc, b_loc, w_cl, b_cl, n_classes):
    # pure-JAX f32 reference (NCHW conv, like PyTorch) for correctness check
    def conv(x, w, b):
        y = jax.lax.conv_general_dilated(
            x, w, window_strides=(1, 1), padding=((1, 1), (1, 1)),
            dimension_numbers=("NCHW", "OIHW", "NCHW"))
        return y + b[None, :, None, None]

    N = x_nchw.shape[0]
    l = jnp.transpose(conv(x_nchw, w_loc, b_loc), (0, 2, 3, 1)).reshape(N, -1, 4)
    c = jnp.transpose(conv(x_nchw, w_cl, b_cl), (0, 2, 3, 1)).reshape(N, -1, n_classes)
    return l, c


if __name__ == "__main__":
    n_classes = 4
    n_boxes = 9
    N, Cin, H, W = 2, 512, 7, 7   # module hard-codes 512-channel 7x7 feature maps

    key = jax.random.PRNGKey(0)
    k_x, k_wl, k_wc = jax.random.split(key, 3)

    x = jax.random.normal(k_x, (N, Cin, H, W), jnp.float32)
    w_loc = _xavier_uniform(k_wl, (n_boxes * 4, Cin, 3, 3))
    b_loc = jnp.zeros((n_boxes * 4,), jnp.float32)
    w_cl = _xavier_uniform(k_wc, (n_boxes * n_classes, Cin, 3, 3))
    b_cl = jnp.zeros((n_boxes * n_classes,), jnp.float32)

    locs, cls = prediction_convolutions(x, w_loc, b_loc, w_cl, b_cl, n_classes)
    locs, cls = jax.block_until_ready((locs, cls))

    ref_locs, ref_cls = _reference(x, w_loc, b_loc, w_cl, b_cl, n_classes)
    assert locs.shape == (N, H * W * n_boxes, 4)
    assert cls.shape == (N, H * W * n_boxes, n_classes)
    # bf16 MXU operands (f32 accumulation) over K=9*512 -> relaxed tolerance.
    assert jnp.allclose(locs, ref_locs, atol=3e-2, rtol=3e-2)
    assert jnp.allclose(cls, ref_cls, atol=3e-2, rtol=3e-2)

    print("KERNEL_OK")
</pallas_src>

<mosaic_0001>
module attributes {stable_mosaic.version = 11 : i64} {
  func.func @_pred_head_kernel(%arg0: i32, %arg1: memref<1x81x512xbf16, #tpu.memory_space<vmem>>, %arg2: memref<9x512x128xbf16, #tpu.memory_space<vmem>>, %arg3: memref<1x128xf32, #tpu.memory_space<vmem>>, %arg4: memref<1x61x128xf32, #tpu.memory_space<vmem>>) attributes {dimension_semantics = [#tpu.dimension_semantics<parallel>], iteration_bounds = array<i64: 2>, scalar_prefetch = 0 : i64, scratch_operands = 0 : i64, tpu.core_type = #tpu.core_type<tc>, window_params = [{transform_indices = @transform_0, window_bounds = array<i64: 1, 81, 512>}, {pipeline_mode = #tpu.pipeline_mode<synchronous>, transform_indices = @transform_1, window_bounds = array<i64: 9, 512, 128>}, {pipeline_mode = #tpu.pipeline_mode<synchronous>, transform_indices = @transform_2, window_bounds = array<i64: 1, 128>}, {transform_indices = @transform_3, window_bounds = array<i64: 1, 61, 128>}]} {
    %c0 = arith.constant 0 : index
    %c0_0 = arith.constant 0 : index
    %0 = vector.load %arg3[%c0, %c0_0] : memref<1x128xf32, #tpu.memory_space<vmem>>, vector<1x128xf32>
    %1 = vector.shape_cast %0 : vector<1x128xf32> to vector<1x128xf32>
    %2 = vector.broadcast %1 : vector<1x128xf32> to vector<61x128xf32>
    %c0_1 = arith.constant 0 : index
    %c0_2 = arith.constant 0 : index
    %c0_3 = arith.constant 0 : index
    %3 = vector.load %arg1[%c0_1, %c0_2, %c0_3] : memref<1x81x512xbf16, #tpu.memory_space<vmem>>, vector<1x61x512xbf16>
    %4 = vector.shape_cast %3 : vector<1x61x512xbf16> to vector<61x512xbf16>
    %c0_4 = arith.constant 0 : index
    %c0_5 = arith.constant 0 : index
    %c0_6 = arith.constant 0 : index
    %5 = vector.load %arg2[%c0_4, %c0_5, %c0_6] : memref<9x512x128xbf16, #tpu.memory_space<vmem>>, vector<1x512x128xbf16>
    %6 = vector.shape_cast %5 : vector<1x512x128xbf16> to vector<512x128xbf16>
    %cst = arith.constant dense<0.000000e+00> : vector<61x128xf32>
    %7 = tpu.matmul %4, %6, %cst {dimension_numbers = #tpu.dot_dimension_numbers<[1], [0], [0], [1], [0, 0, 1, 1], [], []>} : vector<61x512xbf16>, vector<512x128xbf16>, vector<61x128xf32> -> vector<61x128xf32>
    %8 = arith.addf %2, %7 : vector<61x128xf32>
    %c0_7 = arith.constant 0 : index
    %c1 = arith.constant 1 : index
    %c0_8 = arith.constant 0 : index
    %9 = vector.load %arg1[%c0_7, %c1, %c0_8] : memref<1x81x512xbf16, #tpu.memory_space<vmem>>, vector<1x61x512xbf16>
    %10 = vector.shape_cast %9 : vector<1x61x512xbf16> to vector<61x512xbf16>
    %c1_9 = arith.constant 1 : index
    %c0_10 = arith.constant 0 : index
    %c0_11 = arith.constant 0 : index
    %11 = vector.load %arg2[%c1_9, %c0_10, %c0_11] : memref<9x512x128xbf16, #tpu.memory_space<vmem>>, vector<1x512x128xbf16>
    %12 = vector.shape_cast %11 : vector<1x512x128xbf16> to vector<512x128xbf16>
    %cst_12 = arith.constant dense<0.000000e+00> : vector<61x128xf32>
    %13 = tpu.matmul %10, %12, %cst_12 {dimension_numbers = #tpu.dot_dimension_numbers<[1], [0], [0], [1], [0, 0, 1, 1], [], []>} : vector<61x512xbf16>, vector<512x128xbf16>, vector<61x128xf32> -> vector<61x128xf32>
    %14 = arith.addf %8, %13 : vector<61x128xf32>
    %c0_13 = arith.constant 0 : index
    %c2 = arith.constant 2 : index
    %c0_14 = arith.constant 0 : index
    %15 = vector.load %arg1[%c0_13, %c2, %c0_14] : memref<1x81x512xbf16, #tpu.memory_space<vmem>>, vector<1x61x512xbf16>
    %16 = vector.shape_cast %15 : vector<1x61x512xbf16> to vector<61x512xbf16>
    %c2_15 = arith.constant 2 : index
    %c0_16 = arith.constant 0 : index
    %c0_17 = arith.constant 0 : index
    %17 = vector.load %arg2[%c2_15, %c0_16, %c0_17] : memref<9x512x128xbf16, #tpu.memory_space<vmem>>, vector<1x512x128xbf16>
    %18 = vector.shape_cast %17 : vector<1x512x128xbf16> to vector<512x128xbf16>
    %cst_18 = arith.constant dense<0.000000e+00> : vector<61x128xf32>
    %19 = tpu.matmul %16, %18, %cst_18 {dimension_numbers = #tpu.dot_dimension_numbers<[1], [0], [0], [1], [0, 0, 1, 1], [], []>} : vector<61x512xbf16>, vector<512x128xbf16>, vector<61x128xf32> -> vector<61x128xf32>
    %20 = arith.addf %14, %19 : vector<61x128xf32>
    %c0_19 = arith.constant 0 : index
    %c9 = arith.constant 9 : index
    %c0_20 = arith.constant 0 : index
    %21 = vector.load %arg1[%c0_19, %c9, %c0_20] : memref<1x81x512xbf16, #tpu.memory_space<vmem>>, vector<1x61x512xbf16>
    %22 = vector.shape_cast %21 : vector<1x61x512xbf16> to vector<61x512xbf16>
    %c3 = arith.constant 3 : index
    %c0_21 = arith.constant 0 : index
    %c0_22 = arith.constant 0 : index
    %23 = vector.load %arg2[%c3, %c0_21, %c0_22] : memref<9x512x128xbf16, #tpu.memory_space<vmem>>, vector<1x512x128xbf16>
    %24 = vector.shape_cast %23 : vector<1x512x128xbf16> to vector<512x128xbf16>
    %cst_23 = arith.constant dense<0.000000e+00> : vector<61x128xf32>
    %25 = tpu.matmul %22, %24, %cst_23 {dimension_numbers = #tpu.dot_dimension_numbers<[1], [0], [0], [1], [0, 0, 1, 1], [], []>} : vector<61x512xbf16>, vector<512x128xbf16>, vector<61x128xf32> -> vector<61x128xf32>
    %26 = arith.addf %20, %25 : vector<61x128xf32>
    %c0_24 = arith.constant 0 : index
    %c10 = arith.constant 10 : index
    %c0_25 = arith.constant 0 : index
    %27 = vector.load %arg1[%c0_24, %c10, %c0_25] : memref<1x81x512xbf16, #tpu.memory_space<vmem>>, vector<1x61x512xbf16>
    %28 = vector.shape_cast %27 : vector<1x61x512xbf16> to vector<61x512xbf16>
    %c4 = arith.constant 4 : index
    %c0_26 = arith.constant 0 : index
    %c0_27 = arith.constant 0 : index
    %29 = vector.load %arg2[%c4, %c0_26, %c0_27] : memref<9x512x128xbf16, #tpu.memory_space<vmem>>, vector<1x512x128xbf16>
    %30 = vector.shape_cast %29 : vector<1x512x128xbf16> to vector<512x128xbf16>
    %cst_28 = arith.constant dense<0.000000e+00> : vector<61x128xf32>
    %31 = tpu.matmul %28, %30, %cst_28 {dimension_numbers = #tpu.dot_dimension_numbers<[1], [0], [0], [1], [0, 0, 1, 1], [], []>} : vector<61x512xbf16>, vector<512x128xbf16>, vector<61x128xf32> -> vector<61x128xf32>
    %32 = arith.addf %26, %31 : vector<61x128xf32>
    %c0_29 = arith.constant 0 : index
    %c11 = arith.constant 11 : index
    %c0_30 = arith.constant 0 : index
    %33 = vector.load %arg1[%c0_29, %c11, %c0_30] : memref<1x81x512xbf16, #tpu.memory_space<vmem>>, vector<1x61x512xbf16>
    %34 = vector.shape_cast %33 : vector<1x61x512xbf16> to vector<61x512xbf16>
    %c5 = arith.constant 5 : index
    %c0_31 = arith.constant 0 : index
    %c0_32 = arith.constant 0 : index
    %35 = vector.load %arg2[%c5, %c0_31, %c0_32] : memref<9x512x128xbf16, #tpu.memory_space<vmem>>, vector<1x512x128xbf16>
    %36 = vector.shape_cast %35 : vector<1x512x128xbf16> to vector<512x128xbf16>
    %cst_33 = arith.constant dense<0.000000e+00> : vector<61x128xf32>
    %37 = tpu.matmul %34, %36, %cst_33 {dimension_numbers = #tpu.dot_dimension_numbers<[1], [0], [0], [1], [0, 0, 1, 1], [], []>} : vector<61x512xbf16>, vector<512x128xbf16>, vector<61x128xf32> -> vector<61x128xf32>
    %38 = arith.addf %32, %37 : vector<61x128xf32>
    %c0_34 = arith.constant 0 : index
    %c18 = arith.constant 18 : index
    %c0_35 = arith.constant 0 : index
    %39 = vector.load %arg1[%c0_34, %c18, %c0_35] : memref<1x81x512xbf16, #tpu.memory_space<vmem>>, vector<1x61x512xbf16>
    %40 = vector.shape_cast %39 : vector<1x61x512xbf16> to vector<61x512xbf16>
    %c6 = arith.constant 6 : index
    %c0_36 = arith.constant 0 : index
    %c0_37 = arith.constant 0 : index
    %41 = vector.load %arg2[%c6, %c0_36, %c0_37] : memref<9x512x128xbf16, #tpu.memory_space<vmem>>, vector<1x512x128xbf16>
    %42 = vector.shape_cast %41 : vector<1x512x128xbf16> to vector<512x128xbf16>
    %cst_38 = arith.constant dense<0.000000e+00> : vector<61x128xf32>
    %43 = tpu.matmul %40, %42, %cst_38 {dimension_numbers = #tpu.dot_dimension_numbers<[1], [0], [0], [1], [0, 0, 1, 1], [], []>} : vector<61x512xbf16>, vector<512x128xbf16>, vector<61x128xf32> -> vector<61x128xf32>
    %44 = arith.addf %38, %43 : vector<61x128xf32>
    %c0_39 = arith.constant 0 : index
    %c19 = arith.constant 19 : index
    %c0_40 = arith.constant 0 : index
    %45 = vector.load %arg1[%c0_39, %c19, %c0_40] : memref<1x81x512xbf16, #tpu.memory_space<vmem>>, vector<1x61x512xbf16>
    %46 = vector.shape_cast %45 : vector<1x61x512xbf16> to vector<61x512xbf16>
    %c7 = arith.constant 7 : index
    %c0_41 = arith.constant 0 : index
    %c0_42 = arith.constant 0 : index
    %47 = vector.load %arg2[%c7, %c0_41, %c0_42] : memref<9x512x128xbf16, #tpu.memory_space<vmem>>, vector<1x512x128xbf16>
    %48 = vector.shape_cast %47 : vector<1x512x128xbf16> to vector<512x128xbf16>
    %cst_43 = arith.constant dense<0.000000e+00> : vector<61x128xf32>
    %49 = tpu.matmul %46, %48, %cst_43 {dimension_numbers = #tpu.dot_dimension_numbers<[1], [0], [0], [1], [0, 0, 1, 1], [], []>} : vector<61x512xbf16>, vector<512x128xbf16>, vector<61x128xf32> -> vector<61x128xf32>
    %50 = arith.addf %44, %49 : vector<61x128xf32>
    %c0_44 = arith.constant 0 : index
    %c20 = arith.constant 20 : index
    %c0_45 = arith.constant 0 : index
    %51 = vector.load %arg1[%c0_44, %c20, %c0_45] : memref<1x81x512xbf16, #tpu.memory_space<vmem>>, vector<1x61x512xbf16>
    %52 = vector.shape_cast %51 : vector<1x61x512xbf16> to vector<61x512xbf16>
    %c8 = arith.constant 8 : index
    %c0_46 = arith.constant 0 : index
    %c0_47 = arith.constant 0 : index
    %53 = vector.load %arg2[%c8, %c0_46, %c0_47] : memref<9x512x128xbf16, #tpu.memory_space<vmem>>, vector<1x512x128xbf16>
    %54 = vector.shape_cast %53 : vector<1x512x128xbf16> to vector<512x128xbf16>
    %cst_48 = arith.constant dense<0.000000e+00> : vector<61x128xf32>
    %55 = tpu.matmul %52, %54, %cst_48 {dimension_numbers = #tpu.dot_dimension_numbers<[1], [0], [0], [1], [0, 0, 1, 1], [], []>} : vector<61x512xbf16>, vector<512x128xbf16>, vector<61x128xf32> -> vector<61x128xf32>
    %56 = arith.addf %50, %55 : vector<61x128xf32>
    %c0_49 = arith.constant 0 : index
    %c0_50 = arith.constant 0 : index
    %c0_51 = arith.constant 0 : index
    %57 = vector.load %arg4[%c0_49, %c0_50, %c0_51] : memref<1x61x128xf32, #tpu.memory_space<vmem>>, vector<1x61x128xf32>
    %58 = vector.shape_cast %57 : vector<1x61x128xf32> to vector<61x128xf32>
    %59 = vector.shape_cast %56 : vector<61x128xf32> to vector<1x61x128xf32>
    tpu.vector_store %arg4[%c0_49, %c0_50, %c0_51], %59 {strides = array<i32>} : memref<1x61x128xf32, #tpu.memory_space<vmem>>, vector<1x61x128xf32>,
    return
  }
  func.func @transform_0(%arg0: i32) -> (i32, i32, i32) {
    %c0_i32 = arith.constant 0 : i32
    %c0_i32_0 = arith.constant 0 : i32
    %c0_i32_1 = arith.constant 0 : i32
    return %arg0, %c0_i32, %c0_i32_0 : i32, i32, i32
  }
  func.func @transform_1(%arg0: i32) -> (i32, i32, i32) {
    %c0_i32 = arith.constant 0 : i32
    %c0_i32_0 = arith.constant 0 : i32
    %c0_i32_1 = arith.constant 0 : i32
    %c0_i32_2 = arith.constant 0 : i32
    return %c0_i32, %c0_i32_0, %c0_i32_1 : i32, i32, i32
  }
  func.func @transform_2(%arg0: i32) -> (i32, i32) {
    %c0_i32 = arith.constant 0 : i32
    %c0_i32_0 = arith.constant 0 : i32
    %c0_i32_1 = arith.constant 0 : i32
    return %c0_i32, %c0_i32_0 : i32, i32
  }
  func.func @transform_3(%arg0: i32) -> (i32, i32, i32) {
    %c0_i32 = arith.constant 0 : i32
    %c0_i32_0 = arith.constant 0 : i32
    %c0_i32_1 = arith.constant 0 : i32
    return %arg0, %c0_i32, %c0_i32_0 : i32, i32, i32
  }
}

</mosaic_0001>

<bundles_post_ra>
// kernel: _prediction_convolutions_impl.1
= control target key start
LH: loop header
LB: loop body
LE: loop exit
PB: predicated region body
PF: predicated region fallthrough
CT: control target
= control target key end

     0   :  { %s6973_s12 = smov 0   ;;  %s8929_s0 = inlined_call_operand.vmem [shape: bf16[2,81,512], index: 0, kind: input, shape index: {}]   ;;  %s8930_s1 = inlined_call_operand.vmem [shape: bf16[9,512,128], index: 1, kind: input, shape index: {}]   ;;  %s8931_s2 = inlined_call_operand.vmem [shape: f32[1,128], index: 2, kind: input, shape index: {}]   ;;  %s8932_s3 = inlined_call_operand.vmem [shape: f32[2,61,128], index: 3, kind: output, shape index: {}]  }
   0x1 LB: > { %s4932_s13 = sadd.s32 4294967295, %s6951_s12   ;;  %p4936_p0 = scmp.ge.s32.totalorder %s6951_s12, 1  ;;  %s6951_s12 = sphi %s6973_s12, %s13_s12  }
   0x2   : > { %p137_p1 = scmp.lt.s32.totalorder %s6951_s12, 3 }
   0x4   : > { %p138_p2 = pnand %p4936_p0, %p137_p1 }
   0x6   : > { %141 = sbr.rel (%p138_p2) target bundleno = 558 (0x22e), region = 32 }
   0xb   : > { %v6557_v0 = vld [vmem:[%s8930_s1 + $0x78] sm:$0xff]   ;;  %v6561_v4 = vld [vmem:[%s8930_s1 + $0x70] sm:$0xff]   ;;  %v6565_v8 = vld [vmem:[%s8930_s1 + $0x68] sm:$0xff]   ;;  %p161_p3 = scmp.lt.s32.totalorder %s4932_s13, 1  ;;  %vm734_vm0 = vsmask.f32 7424 }
   0xc   : > { %v6558_v1 = vld [vmem:[%s8930_s1 + $0xf8] sm:$0xff]   ;;  %5828 = vmatprep.subr.bf16.mxu0 %v6557_v0  ;;  %v6562_v5 = vld [vmem:[%s8930_s1 + $0xf0] sm:$0xff]   ;;  %v6566_v9 = vld [vmem:[%s8930_s1 + $0xe8] sm:$0xff]   ;;  %vm1294_vm1 = vcmask 1046528   ;;  %vm2812_vm2 = vsmask.f32 6400 }
   0xd   : > { %v6559_v2 = vld [vmem:[%s8930_s1 + $0x38] sm:$0xff]   ;;  %5868 = vmatprep.subr.bf16.mxu1 %v6558_v1  ;;  %v6563_v6 = vld [vmem:[%s8930_s1 + $0x30] sm:$0xff]   ;;  %v6567_v10 = vld [vmem:[%s8930_s1 + $0x28] sm:$0xff]   ;;  %s8976_s13 = smov (!%p161_p3, %s4932_s13), 1  ;;  %vm4486_vm3 = vcmask 1045504  }
   0xe   : > { %v6560_v3 = vld [vmem:[%s8930_s1 + $0xb8] sm:$0xff]   ;;  %5829 = vmatpush3.bf16.msra.mxu0 %v6559_v2  ;;  %v6564_v7 = vld [vmem:[%s8930_s1 + $0xb0] sm:$0xff]   ;;  %v6568_v11 = vld [vmem:[%s8930_s1 + $0xa8] sm:$0xff]   ;;  %s6548_s16 = smul.u32 176, %s8976_s13 }
   0xf   : > { %5869 = vmatpush3.bf16.msra.mxu1 %v6560_v3  ;;  %5830 = vmatprep.subr.bf16.mxu0 %v6561_v4  ;;  %v6569_v12 = vld [vmem:[%s8930_s1 + $0x60] sm:$0xff]   ;;  %v6573_v16 = vld [vmem:[%s8930_s1 + $0x58] sm:$0xff]   ;;  %v6577_v20 = vld [vmem:[%s8930_s1 + $0x50] sm:$0xff]  }
  0x10   : > { %5870 = vmatprep.subr.bf16.mxu1 %v6562_v5  ;;  %v6570_v13 = vld [vmem:[%s8930_s1 + $0xe0] sm:$0xff]   ;;  %v6574_v17 = vld [vmem:[%s8930_s1 + $0xd8] sm:$0xff]   ;;  %v6578_v21 = vld [vmem:[%s8930_s1 + $0xd0] sm:$0xff]   ;;  %s7081_s27 = scalar_lea.vmem %s8929_s0, %s6548_s16 }
  0x11   : > { %v6571_v14 = vld [vmem:[%s8930_s1 + $0x20] sm:$0xff]   ;;  %v6575_v18 = vld [vmem:[%s8930_s1 + $0x18] sm:$0xff]   ;;  %v6579_v22 = vld [vmem:[%s8930_s1 + $0x10] sm:$0xff]  }
  0x12   : > { %5831 = vmatpush3.bf16.msra.mxu0 %v6563_v6  ;;  %v6572_v15 = vld [vmem:[%s8930_s1 + $0xa0] sm:$0xff]   ;;  %v6576_v19 = vld [vmem:[%s8930_s1 + $0x98] sm:$0xff]   ;;  %v6580_v23 = vld [vmem:[%s8930_s1 + $0x90] sm:$0xff]  }
  0x13   : > { %5871 = vmatpush3.bf16.msra.mxu1 %v6564_v7  ;;  %5832 = vmatprep.subr.bf16.mxu0 %v6565_v8  ;;  %v6581_v24 = vld [vmem:[%s8930_s1 + $0x48] sm:$0xff]   ;;  %v6585_v28 = vld [vmem:[%s8930_s1 + $0x40] sm:$0xff]   ;;  %v7091_v33 = vld [vmem:[%s7081_s27 + $0x10] sm:$0xff] }
  0x14   : > { %5872 = vmatprep.subr.bf16.mxu1 %v6566_v9  ;;  %v6582_v25 = vld [vmem:[%s8930_s1 + $0xc8] sm:$0xff]   ;;  %v6586_v29 = vld [vmem:[%s8930_s1 + $0xc0] sm:$0xff]   ;;  %v7098_v36 = vld [vmem:[%s7081_s27 + $0x18] sm:$0xff] }
  0x15   : > { %v6583_v26 = vld [vmem:[%s8930_s1 + $0x8] sm:$0xff]   ;;  %v6587_v30 = vld [vmem:[%s8930_s1] sm:$0xff]   ;;  %v6593_v40 = vld [vmem:[%s8930_s1 + $0x178] sm:$0xff]  }
  0x16   : > { %5833 = vmatpush3.bf16.msra.mxu0 %v6567_v10  ;;  %v6584_v27 = vld [vmem:[%s8930_s1 + $0x88] sm:$0xff]   ;;  %v6588_v31 = vld [vmem:[%s8930_s1 + $0x80] sm:$0xff]   ;;  %v6594_v41 = vld [vmem:[%s8930_s1 + $0x1f8] sm:$0xff]  }
  0x17   : > { %5873 = vmatpush3.bf16.msra.mxu1 %v6568_v11  ;;  %5834 = vmatprep.subr.bf16.mxu0 %v6569_v12  ;;  %v179_v32 = vld [vmem:[%s7081_s27] sm:$0xff]  ;;  %v180_v34 = vld [vmem:[%s7081_s27 + $0x8] sm:$0xff]  ;;  %v6595_v42 = vld [vmem:[%s8930_s1 + $0x138] sm:$0xff]  }
  0x18   : > { %5874 = vmatprep.subr.bf16.mxu1 %v6570_v13  ;;  %v7095_v35 = vcombine.high %v179_v32, %v7091_v33  ;;  %v7101_v37 = vcombine.low %v179_v32, %v7091_v33  ;;  %v7104_v38 = vcombine.high %v180_v34, %v7098_v36  ;;  %v7107_v39 = vcombine.low %v180_v34, %v7098_v36  ;;  %v6596_v43 = vld [vmem:[%s8930_s1 + $0x1b8] sm:$0xff]   ;;  %v6597_v44 = vld [vmem:[%s8930_s1 + $0x170] sm:$0xff]   ;;  %v6607_v56 = vld [vmem:[%s8930_s1 + $0x168] sm:$0xff]  }
  0x19   : > { %v6598_v45 = vld [vmem:[%s8930_s1 + $0x1f0] sm:$0xff]   ;;  %v7144_v52 = vld [vmem:[%s7081_s27 + $0x2c] ss:$16 sps:$4 sm:$0xff]   ;;  %v7151_v54 = vld [vmem:[%s7081_s27 + $0x28] ss:$16 sps:$4 sm:$0xff]  }
  0x1a   : > { %5835 = vmatpush3.bf16.msra.mxu0 %v6571_v14  ;;  %563 = vmatprep.mubr.bf16.mxu0 %v7095_v35  ;;  %v6599_v46 = vld [vmem:[%s8930_s1 + $0x130] sm:$0xff]   ;;  %v750_v48 = vshll.u32 %v7095_v35, 16  ;;  %v736_v50 = vshrl.u32 %v7101_v37, 16  ;;  %v738_v51 = vshll.u32 %v7101_v37, 16  ;;  %v762_v55 = vshll.u32 %v7107_v39, 16  ;;  %v6608_v58 = vld [vmem:[%s8930_s1 + $0x1e8] sm:$0xff]  }
  0x1b   : > { %5875 = vmatpush3.bf16.msra.mxu1 %v6572_v15  ;;  %5836 = vmatprep.subr.bf16.mxu0 %v6573_v16  ;;  %v6600_v47 = vld [vmem:[%s8930_s1 + $0x1b0] sm:$0xff]   ;;  %v774_v57 = vshll.u32 %v7104_v38, 16  ;;  %v760_v59 = vshrl.u32 %v7107_v39, 16  ;;  %v6609_v60 = vld [vmem:[%s8930_s1 + $0x128] sm:$0xff]   ;;  %v6611_v0 = vld [vmem:[%s8930_s1 + $0x160] sm:$0xff]   ;;  %v748_v2 = vshrl.u32 %v7095_v35, 16 }
  0x1c   : > { %5876 = vmatprep.subr.bf16.mxu1 %v6574_v17  ;;  %628 = vmatprep.mubr.bf16.mxu1 %v7104_v38  ;;  %v7139_v49 = vld [vmem:[%s7081_s27 + $0x24] ss:$16 sps:$4 sm:$0xff]   ;;  %v7148_v53 = vld [vmem:[%s7081_s27 + $0x20] ss:$16 sps:$4 sm:$0xff]   ;;  %v7168_v61 = vrot.slane %v738_v51, 1  ;;  %v6610_v62 = vld [vmem:[%s8930_s1 + $0x1a8] sm:$0xff]  }
  0x1d   : > { %v7173_v63 = vrot.slane %v762_v55, 1  ;;  %v6612_v1 = vld [vmem:[%s8930_s1 + $0x1e0] sm:$0xff]   ;;  %v752_v4 = vrot.slane %v750_v48, 1  ;;  %v755_v7 = vshll.u32 %v7139_v49, 16  ;;  %v772_v8 = vshrl.u32 %v7104_v38, 16  ;;  %v189_v9 = vld [vmem:[%s7081_s27 + $0x50] sm:$0xff] }
  0x1e   : > { %5837 = vmatpush3.bf16.msra.mxu0 %v6575_v18  ;;  %v6613_v3 = vld [vmem:[%s8930_s1 + $0x120] sm:$0xff]   ;;  %v7195_v10 = vld [vmem:[%s7081_s27 + $0x48] sm:$0xff]  ;;  %v190_v11 = vld [vmem:[%s7081_s27 + $0x58] sm:$0xff]  ;;  %v776_v12 = vrot.slane %v774_v57, 1  ;;  %v779_v13 = vshll.u32 %v7144_v52, 16  ;;  %v743_v14 = vshll.u32 %v7148_v53, 16 }
  0x1f   : > { %5877 = vmatpush3.bf16.msra.mxu1 %v6576_v19  ;;  %5838 = vmatprep.subr.bf16.mxu0 %v6577_v20  ;;  %v6614_v5 = vld [vmem:[%s8930_s1 + $0x1a0] sm:$0xff]   ;;  %v7204_v16 = vcombine.high %v7195_v10, %v190_v11  ;;  %v7210_v18 = vcombine.low %v7195_v10, %v190_v11  ;;  %v6619_v19 = vld [vmem:[%s8930_s1 + $0x158] sm:$0xff]   ;;  %v6626_v32 = vld [vmem:[%s8930_s1 + $0x190] sm:$0xff]   ;;  %v807_v34 = vshrl.u32 %v7144_v52, 16 }
  0x20   : > { %5878 = vmatprep.subr.bf16.mxu1 %v6578_v21  ;;  %v7189_v6 = vld [vmem:[%s7081_s27 + $0x40] sm:$0xff]  ;;  %v6620_v20 = vld [vmem:[%s8930_s1 + $0x1d8] sm:$0xff]   ;;  %v767_v21 = vshll.u32 %v7151_v54, 16  ;;  %v193_v38 = vld [vmem:[%s7081_s27 + $0x70] sm:$0x77] }
  0x21   : > { %v7201_v15 = vcombine.high %v7189_v6, %v189_v9  ;;  %v7207_v17 = vcombine.low %v7189_v6, %v189_v9  ;;  %v7248_v35 = vld [vmem:[%s7081_s27 + $0x60] sm:$0xff]  ;;  %v6631_v55 = vld [vmem:[%s8930_s1 + $0x148] sm:$0xff]   ;;  %v765_v9 = vor.u32 %v7173_v63, %v760_v59  ;;  %v803_v11 = vshll.u32 %v7210_v18, 16  ;;  %v6639_v63 = vld [vmem:[%s8930_s1 + $0x278] sm:$0xff]  }
  0x22   : > { %5839 = vmatpush3.bf16.msra.mxu0 %v6579_v22  ;;  %v6621_v22 = vld [vmem:[%s8930_s1 + $0x118] sm:$0xff]   ;;  %v6632_v57 = vld [vmem:[%s8930_s1 + $0x1c8] sm:$0xff]  }
  0x23   : > { %5879 = vmatpush3.bf16.msra.mxu1 %v6580_v23  ;;  %5840 = vmatprep.subr.bf16.mxu0 %v6581_v24  ;;  %v757_v23 = vrot.slane %v755_v7, 1  ;;  %v6622_v24 = vld [vmem:[%s8930_s1 + $0x198] sm:$0xff]  }
  0x24   : > { %5880 = vmatprep.subr.bf16.mxu1 %v6582_v25  ;;  %v781_v25 = vrot.slane %v779_v13, 1 }
  0x26   : > { %5841 = vmatpush3.bf16.msra.mxu0 %v6583_v26  ;;  %v6623_v26 = vld [vmem:[%s8930_s1 + $0x150] sm:$0xff]   ;;  %v809_v13 = vor.u32 %v807_v34, %v781_v25 }
  0x27   : > { %5881 = vmatpush3.bf16.msra.mxu1 %v6584_v27  ;;  %5842 = vmatprep.subr.bf16.mxu0 %v6585_v28  ;;  %v7232_v27 = vrot.slane %v743_v14, 1  ;;  %v6624_v28 = vld [vmem:[%s8930_s1 + $0x1d0] sm:$0xff]  }
  0x28   : > { %5882 = vmatprep.subr.bf16.mxu1 %v6586_v29  ;;  %v7237_v29 = vrot.slane %v767_v21, 1  ;;  %v805_v21 = vrot.slane %v803_v11, 1  ;;  %v6644_v34 = vld [vmem:[%s8930_s1 + $0x2f0] sm:$0xff]  }
  0x2a   : > { %5843 = vmatpush3.bf16.msra.mxu0 %v6587_v30  ;;  %v6625_v30 = vld [vmem:[%s8930_s1 + $0x110] sm:$0xff]  }
  0x2b   : > { %5883 = vmatpush3.bf16.msra.mxu1 %v6588_v31  ;;  %5908 = vmatprep.subr.bf16.mxu0 %v6593_v40  ;;  %v791_v31 = vshrl.u32 %v7139_v49, 16  ;;  %v7252_v40 = vld [vmem:[%s7081_s27 + $0x68] sm:$0xff] }
  0x2c   : > { %5948 = vmatprep.subr.bf16.mxu1 %v6594_v41  ;;  %v753_v41 = vor.u32 %v752_v4, %v748_v2  ;;  %v6635_v4 = vld [vmem:[%s8930_s1 + $0x140] sm:$0xff]  }
  0x2d   : > { %564 = vmatmul.mubr.bf16.vlgmr.msra.gmra.mxu0 %v7101_v37  ;;  %v6637_v37 = vld [vmem:[%s8930_s1 + $0x100] sm:$0xff]  }
  0x2e   : > { %629 = vmatmul.mubr.bf16.vlgmr.msra.gmra.mxu1 %v7107_v39  ;;  %5909 = vmatpush3.bf16.msra.mxu0 %v6595_v42  ;;  %v795_v42 = vshll.u32 %v7201_v15, 16  ;;  %v823_v39 = vshrl.u32 %v7201_v15, 16 }
  0x2f   : > { %5949 = vmatpush3.bf16.msra.mxu1 %v6596_v43  ;;  %5910 = vmatprep.subr.bf16.mxu0 %v6597_v44  ;;  %v783_v43 = vshrl.u32 %v7148_v53, 16  ;;  %v7257_v44 = vcombine.high %v7248_v35, %v193_v38 }
  0x30   : > { %5950 = vmatprep.subr.bf16.mxu1 %v6598_v45  ;;  %571 = vmatprep.mubr.bf16.mxu0 %v7139_v49  ;;  %v194_v45 = vld [vmem:[%s7081_s27 + $0x78] sm:$0x77] }
  0x31   : > { %636 = vmatprep.mubr.bf16.mxu1 %v7144_v52  ;;  %v7264_v48 = vcombine.high %v7252_v40, %v194_v45  ;;  %v7267_v51 = vcombine.low %v7252_v40, %v194_v45  ;;  %v827_v14 = vshll.u32 %v7257_v44, 16 }
  0x32   : > { %5911 = vmatpush3.bf16.msra.mxu0 %v6599_v46  ;;  %v7261_v46 = vcombine.low %v7248_v35, %v193_v38 }
  0x33   : > { %5951 = vmatpush3.bf16.msra.mxu1 %v6600_v47  ;;  %5912 = vmatprep.subr.bf16.mxu0 %v6607_v56  ;;  %v777_v47 = vor.u32 %v776_v12, %v772_v8  ;;  %v811_v56 = vshll.u32 %v7204_v16, 16  ;;  %v6636_v8 = vld [vmem:[%s8930_s1 + $0x1c0] sm:$0xff]  }
  0x34   : > { %5952 = vmatprep.subr.bf16.mxu1 %v6608_v58  ;;  %v799_v58 = vshrl.u32 %v7151_v54, 16  ;;  %v6638_v12 = vld [vmem:[%s8930_s1 + $0x180] sm:$0xff]  }
  0x35   : > { %572 = vmatmul.mubr.bf16.gmra.mxu0 %v7148_v53  ;;  %v782_v2 = vsel %vm734_vm0, %v777_v47, %v781_v25  ;;  %v813_v7 = vrot.slane %v811_v56, 1  ;;  %v6642_v25 = vld [vmem:[%s8930_s1 + $0x2b8] sm:$0xff]   ;;  %v6647_v56 = vld [vmem:[%s8930_s1 + $0x268] sm:$0xff]  }
  0x36   : > { %637 = vmatmul.mubr.bf16.gmra.mxu1 %v7151_v54  ;;  %5913 = vmatpush3.bf16.msra.mxu0 %v6609_v60  ;;  %v6633_v60 = vld [vmem:[%s8930_s1 + $0x108] sm:$0xff]   ;;  %v801_v38 = vor.u32 %v799_v58, %v7237_v29 }
  0x37   : > { %5953 = vmatpush3.bf16.msra.mxu1 %v6610_v62  ;;  %5914 = vmatprep.subr.bf16.mxu0 %v6611_v0  ;;  %v758_v62 = vsel %vm734_vm0, %v753_v41, %v757_v23  ;;  %v787_v0 = vshll.u32 %v7207_v17, 16  ;;  %v815_v41 = vshrl.u32 %v7207_v17, 16 }
  0x38   : > { %5954 = vmatprep.subr.bf16.mxu1 %v6612_v1  ;;  %579 = vmatprep.mubr.bf16.mxu0 %v7201_v15  ;;  %v6634_v1 = vld [vmem:[%s8930_s1 + $0x188] sm:$0xff]   ;;  %v806_v58 = vsel %vm734_vm0, %v801_v38, %v805_v21  ;;  %v1305_v38 = vrot.slane %v7144_v52, 1  ;;  %v1205_v52 = vld [vmem:[%s7081_s27] sm:$0xee] }
  0x39   : > { %644 = vmatprep.mubr.bf16.mxu1 %v7204_v16 }
  0x3a   : > { %5915 = vmatpush3.bf16.msra.mxu0 %v6613_v3  ;;  %v797_v3 = vrot.slane %v795_v42, 1  ;;  %v6645_v42 = vld [vmem:[%s8930_s1 + $0x230] sm:$0xff]  }
  0x3b   : > { %5955 = vmatpush3.bf16.msra.mxu1 %v6614_v5  ;;  %5916 = vmatprep.subr.bf16.mxu0 %v6619_v19  ;;  %v741_v5 = vor.u32 %v7168_v61, %v736_v50  ;;  %v793_v50 = vor.u32 %v791_v31, %v757_v23  ;;  %v789_v61 = vrot.slane %v787_v0, 1  ;;  %v770_v19 = vsel %vm734_vm0, %v765_v9, %v7237_v29  ;;  %v6649_v0 = vld [vmem:[%s8930_s1 + $0x228] sm:$0xff]   ;;  %v6652_v9 = vld [vmem:[%s8930_s1 + $0x2e0] sm:$0xff]  }
  0x3c   : > { %5956 = vmatprep.subr.bf16.mxu1 %v6620_v20  ;;  %v6640_v20 = vld [vmem:[%s8930_s1 + $0x2f8] sm:$0xff]   ;;  %v785_v31 = vor.u32 %v783_v43, %v7232_v27  ;;  %v825_v45 = vor.u32 %v823_v39, %v797_v3 }
  0x3d   : > { %580 = vmatmul.mubr.bf16.gmra.mxu0 %v7207_v17  ;;  %v746_v59 = vsel %vm734_vm0, %v741_v5, %v7232_v27  ;;  %v798_v23 = vsel %vm734_vm0, %v793_v50, %v797_v3  ;;  %v6646_v27 = vld [vmem:[%s8930_s1 + $0x2b0] sm:$0xff]   ;;  %v6651_v5 = vld [vmem:[%s8930_s1 + $0x260] sm:$0xff]  }
  0x3e   : > { %645 = vmatmul.mubr.bf16.gmra.mxu1 %v7210_v18  ;;  %5917 = vmatpush3.bf16.msra.mxu0 %v6621_v22  ;;  %v6641_v22 = vld [vmem:[%s8930_s1 + $0x238] sm:$0xff]   ;;  %v790_v29 = vsel %vm734_vm0, %v785_v31, %v789_v61  ;;  %v6653_v50 = vld [vmem:[%s8930_s1 + $0x220] sm:$0xff]   ;;  %v6666_v31 = vld [vmem:[%s8930_s1 + $0x288] sm:$0xff]  }
  0x3f   : > { %5957 = vmatpush3.bf16.msra.mxu1 %v6622_v24  ;;  %5918 = vmatprep.subr.bf16.mxu0 %v6623_v26  ;;  %v843_v24 = vshll.u32 %v7264_v48, 16  ;;  %v814_v26 = vsel %vm734_vm0, %v809_v13, %v813_v7  ;;  %v6655_v13 = vld [vmem:[%s8930_s1 + $0x258] sm:$0xff]  }
  0x40   : > { %5958 = vmatprep.subr.bf16.mxu1 %v6624_v28  ;;  %587 = vmatprep.mubr.bf16.mxu0 %v7257_v44  ;;  %v839_v28 = vshrl.u32 %v7204_v16, 16 }
  0x41   : > { %652 = vmatprep.mubr.bf16.mxu1 %v7264_v48  ;;  %v845_v47 = vrot.slane %v843_v24, 1  ;;  %v6661_v24 = vld [vmem:[%s8930_s1 + $0x210] sm:$0xff]  }
  0x42   : > { %5919 = vmatpush3.bf16.msra.mxu0 %v6625_v30  ;;  %v6643_v30 = vld [vmem:[%s8930_s1 + $0x270] sm:$0xff]   ;;  %v841_v43 = vor.u32 %v839_v28, %v813_v7  ;;  %v817_v7 = vor.u32 %v815_v41, %v789_v61  ;;  %v6664_v28 = vld [vmem:[%s8930_s1 + $0x2c8] sm:$0xff]   ;;  %v6668_v41 = vld [vmem:[%s8930_s1 + $0x2c0] sm:$0xff]  }
  0x43   : > { %5959 = vmatpush3.bf16.msra.mxu1 %v6626_v32  ;;  %5920 = vmatprep.subr.bf16.mxu0 %v6631_v55  ;;  %v829_v32 = vrot.slane %v827_v14, 1  ;;  %v819_v55 = vshll.u32 %v7261_v46, 16 }
  0x44   : > { %5960 = vmatprep.subr.bf16.mxu1 %v6632_v57  ;;  %v831_v57 = vshrl.u32 %v7210_v18, 16  ;;  %v846_v3 = vsel %vm734_vm0, %v841_v43, %v845_v47  ;;  %v1309_v43 = vrot.slane %v7201_v15, 1  ;;  %v6699_v15 = vld [vmem:[%s8930_s1 + $0x350] sm:$0xff]  }
  0x45   : > { %588 = vmatmul.mubr.bf16.gmra.mxu0 %v7261_v46 }
  0x46   : > { %653 = vmatmul.mubr.bf16.gmra.mxu1 %v7267_v51  ;;  %5921 = vmatpush3.bf16.msra.mxu0 %v6633_v60  ;;  %v6648_v60 = vld [vmem:[%s8930_s1 + $0x2e8] sm:$0xff]   ;;  %v833_v11 = vor.u32 %v831_v57, %v805_v21  ;;  %v6659_v21 = vld [vmem:[%s8930_s1 + $0x250] sm:$0xff]   ;;  %v6676_v57 = vld [vmem:[%s8930_s1 + $0x3f8] sm:$0xff]  }
  0x47   : > { %5961 = vmatpush3.bf16.msra.mxu1 %v6634_v1  ;;  %1099 = vmatprep.mubr.bf16.mxu0 %v758_v62  ;;  %v835_v62 = vshll.u32 %v7267_v51, 16  ;;  %v830_v1 = vsel %vm734_vm0, %v825_v45, %v829_v32  ;;  %v1302_v45 = vrot.slane %v7151_v54, 1  ;;  %v6675_v54 = vld [vmem:[%s8930_s1 + $0x378] sm:$0xff]  }
  0x48   : > { %5922 = vmatprep.subr.bf16.mxu0 %v6635_v4  ;;  %1164 = vmatprep.mubr.bf16.mxu1 %v782_v2  ;;  %v6650_v2 = vld [vmem:[%s8930_s1 + $0x2a8] sm:$0xff]   ;;  %v821_v4 = vrot.slane %v819_v55, 1  ;;  %v5149_v55 = vcombine.low %v1205_v52, %v7091_v33 }
  0x49   : > { %5962 = vmatprep.subr.bf16.mxu1 %v6636_v8  ;;  %v850_v8 = vshrl.u32 %v7257_v44, 16  ;;  %v6654_v44 = vld [vmem:[%s8930_s1 + $0x2a0] sm:$0xff]  }
  0x4a   : > { %5923 = vmatpush3.bf16.msra.mxu0 %v6637_v37  ;;  %v837_v37 = vrot.slane %v835_v62, 1  ;;  %v822_v61 = vsel %vm734_vm0, %v817_v7, %v821_v4  ;;  %v6679_v7 = vld [vmem:[%s8930_s1 + $0x370] sm:$0xff]  }
  0x4b   : > { %5963 = vmatpush3.bf16.msra.mxu1 %v6638_v12  ;;  %5988 = vmatprep.subr.bf16.mxu0 %v6639_v63  ;;  %v856_v12 = vshrl.u32 %v7264_v48, 16  ;;  %v852_v48 = vor.u32 %v850_v8, %v829_v32  ;;  %v6657_v63 = vld [vmem:[%s8930_s1 + $0x218] sm:$0xff]   ;;  %v1299_v32 = vrot.slane %v7139_v49, 1  ;;  %v6669_v49 = vld [vmem:[%s8930_s1 + $0x200] sm:$0xff]   ;;  %v6680_v8 = vld [vmem:[%s8930_s1 + $0x3f0] sm:$0xff]  }
  0x4c   : > { %6028 = vmatprep.subr.bf16.mxu1 %v6640_v20  ;;  %v838_v39 = vsel %vm734_vm0, %v833_v11, %v837_v37  ;;  %v847_v20 = vshrl.u32 %v7261_v46, 16  ;;  %v6662_v46 = vld [vmem:[%s8930_s1 + $0x290] sm:$0xff]  }
  0x4d   : > { %1100 = vmatmul.mubr.bf16.vlgmr.msra.gmra.mxu0 %v746_v59  ;;  %v6656_v59 = vld [vmem:[%s8930_s1 + $0x2d8] sm:$0xff]   ;;  %v858_v14 = vor.u32 %v856_v12, %v845_v47  ;;  %v6670_v47 = vld [vmem:[%s8930_s1 + $0x280] sm:$0xff]   ;;  %v1311_v12 = vrot.slane %v7210_v18, 1 }
  0x4e   : > { %1165 = vmatmul.mubr.bf16.vlgmr.msra.gmra.mxu1 %v770_v19  ;;  %5989 = vmatpush3.bf16.msra.mxu0 %v6641_v22  ;;  %v6658_v19 = vld [vmem:[%s8930_s1 + $0x298] sm:$0xff]   ;;  %v853_v22 = vshrl.u32 %v7267_v51, 16 }
  0x4f   : > { %6029 = vmatpush3.bf16.msra.mxu1 %v6642_v25  ;;  %1107 = vmatprep.mubr.bf16.mxu0 %v798_v23  ;;  %v6660_v23 = vld [vmem:[%s8930_s1 + $0x2d0] sm:$0xff]   ;;  %v849_v25 = vor.u32 %v847_v20, %v821_v4 }
  0x50   : > { %5990 = vmatprep.subr.bf16.mxu0 %v6643_v30  ;;  %1172 = vmatprep.mubr.bf16.mxu1 %v814_v26  ;;  %v855_v51 = vor.u32 %v853_v22, %v837_v37  ;;  %v6663_v26 = vld [vmem:[%s8930_s1 + $0x248] sm:$0xff]   ;;  %v1307_v37 = vrot.slane %v7207_v17, 1  ;;  %v7508_v20 = vld [vmem:[%s7081_s27 + $0x70] sm:$0xff]  ;;  %v7513_v22 = vld [vmem:[%s7081_s27 + $0x78] sm:$0xff] }
  0x51   : > { %6030 = vmatprep.subr.bf16.mxu1 %v6644_v34  ;;  %v6665_v30 = vld [vmem:[%s8930_s1 + $0x208] sm:$0xff]   ;;  %v6667_v34 = vld [vmem:[%s8930_s1 + $0x240] sm:$0xff]  }
  0x52   : > { %5991 = vmatpush3.bf16.msra.mxu0 %v6645_v42  ;;  %v1296_v42 = vrot.slane %v7148_v53, 1  ;;  %v5150_v53 = vcombine.high %v1205_v52, %v7091_v33  ;;  %v6677_v33 = vld [vmem:[%s8930_s1 + $0x338] sm:$0xff]   ;;  %v6683_v17 = vld [vmem:[%s8930_s1 + $0x368] sm:$0xff]  }
  0x53   : > { %6031 = vmatpush3.bf16.msra.mxu1 %v6646_v27  ;;  %5992 = vmatprep.subr.bf16.mxu0 %v6647_v56  ;;  %v1206_v27 = vld [vmem:[%s7081_s27 + $0x8] sm:$0xee] }
  0x54   : > { %6032 = vmatprep.subr.bf16.mxu1 %v6648_v60  ;;  %v5152_v56 = vcombine.high %v1206_v27, %v7098_v36  ;;  %v1295_v60 = vrot.slane %v5149_v55, 1  ;;  %v1298_v62 = vrot.slane %v5150_v53, 1  ;;  %v1308_v18 = vsel %vm1294_vm1, %v1296_v42, %v1307_v37  ;;  %v6705_v52 = vld [vmem:[%s8930_s1 + $0x308] sm:$0xff]   ;;  %v6708_v55 = vld [vmem:[%s8930_s1 + $0x3c0] sm:$0xff]  }
  0x55   : > { %1108 = vmatmul.mubr.bf16.gmra.mxu0 %v790_v29  ;;  %v5151_v29 = vcombine.low %v1206_v27, %v7098_v36  ;;  %v6706_v27 = vld [vmem:[%s8930_s1 + $0x388] sm:$0xff]   ;;  %v6709_v53 = vld [vmem:[%s8930_s1 + $0x300] sm:$0xff]  }
  0x56   : > { %1173 = vmatmul.mubr.bf16.gmra.mxu1 %v806_v58  ;;  %5993 = vmatpush3.bf16.msra.mxu0 %v6649_v0  ;;  %v1313_v58 = vrot.slane %v7204_v16, 1  ;;  %v1300_v36 = vsel %vm1294_vm1, %v1298_v62, %v1299_v32  ;;  %v6701_v16 = vld [vmem:[%s8930_s1 + $0x310] sm:$0xff]  }
  0x57   : > { %6033 = vmatpush3.bf16.msra.mxu1 %v6650_v2  ;;  %1115 = vmatprep.mubr.bf16.mxu0 %v830_v1  ;;  %v1301_v0 = vrot.slane %v5151_v29, 1  ;;  %v1304_v1 = vrot.slane %v5152_v56, 1  ;;  %v6710_v29 = vld [vmem:[%s8930_s1 + $0x380] sm:$0xff]   ;;  %v1669_v56 = vld [vmem:[%s7081_s27 + $0x10] sm:$0xff] }
  0x58   : > { %5994 = vmatprep.subr.bf16.mxu0 %v6651_v5  ;;  %1180 = vmatprep.mubr.bf16.mxu1 %v846_v3  ;;  %v1297_v3 = vsel %vm1294_vm1, %v1295_v60, %v1296_v42  ;;  %v6678_v5 = vld [vmem:[%s8930_s1 + $0x3b8] sm:$0xff]   ;;  %v1314_v11 = vsel %vm1294_vm1, %v1305_v38, %v1313_v58  ;;  %v6700_v42 = vld [vmem:[%s8930_s1 + $0x3d0] sm:$0xff]  }
  0x59   : > { %6034 = vmatprep.subr.bf16.mxu1 %v6652_v9  ;;  %v1306_v2 = vsel %vm1294_vm1, %v1304_v1, %v1305_v38  ;;  %v1303_v4 = vsel %vm1294_vm1, %v1301_v0, %v1302_v45  ;;  %v1310_v9 = vsel %vm1294_vm1, %v1299_v32, %v1309_v43 }
  0x5a   : > { %5995 = vmatpush3.bf16.msra.mxu0 %v6653_v50  ;;  %v6681_v50 = vld [vmem:[%s8930_s1 + $0x330] sm:$0xff]  }
  0x5b   : > { %6035 = vmatpush3.bf16.msra.mxu1 %v6654_v44  ;;  %5996 = vmatprep.subr.bf16.mxu0 %v6655_v13  ;;  %v6682_v44 = vld [vmem:[%s8930_s1 + $0x3b0] sm:$0xff]   ;;  %v1312_v13 = vsel %vm1294_vm1, %v1302_v45, %v1311_v12  ;;  %v6703_v45 = vld [vmem:[%s8930_s1 + $0x348] sm:$0xff]  }
  0x5c   : > { %6036 = vmatprep.subr.bf16.mxu1 %v6656_v59  ;;  %v6686_v59 = vld [vmem:[%s8930_s1 + $0x3a8] sm:$0xff]  }
  0x5d   : > { %1116 = vmatmul.mubr.bf16.gmra.mxu0 %v822_v61  ;;  %v6684_v61 = vld [vmem:[%s8930_s1 + $0x3e8] sm:$0xff]  }
  0x5e   : > { %1181 = vmatmul.mubr.bf16.gmra.mxu1 %v838_v39  ;;  %5997 = vmatpush3.bf16.msra.mxu0 %v6657_v63  ;;  %v6685_v39 = vld [vmem:[%s8930_s1 + $0x328] sm:$0xff]   ;;  %v6688_v63 = vld [vmem:[%s8930_s1 + $0x3e0] sm:$0xff]  }
  0x5f   : > { %6037 = vmatpush3.bf16.msra.mxu1 %v6658_v19  ;;  %1123 = vmatprep.mubr.bf16.mxu0 %v852_v48  ;;  %v6687_v48 = vld [vmem:[%s8930_s1 + $0x360] sm:$0xff]  }
  0x60   : > { %5998 = vmatprep.subr.bf16.mxu0 %v6659_v21  ;;  %1188 = vmatprep.mubr.bf16.mxu1 %v858_v14  ;;  %v6689_v14 = vld [vmem:[%s8930_s1 + $0x320] sm:$0xff]   ;;  %v5154_v21 = vcombine.high %v7248_v35, %v7508_v20 }
  0x61   : > { %6038 = vmatprep.subr.bf16.mxu1 %v6660_v23  ;;  %v6690_v19 = vld [vmem:[%s8930_s1 + $0x3a0] sm:$0xff]   ;;  %v5153_v23 = vcombine.low %v7248_v35, %v7508_v20  ;;  %v6697_v35 = vld [vmem:[%s8930_s1 + $0x318] sm:$0xff]  }
  0x62   : > { %5999 = vmatpush3.bf16.msra.mxu0 %v6661_v24  ;;  %v5156_v24 = vcombine.high %v7252_v40, %v7513_v22 }
  0x63   : > { %6039 = vmatpush3.bf16.msra.mxu1 %v6662_v46  ;;  %6000 = vmatprep.subr.bf16.mxu0 %v6663_v26  ;;  %v5155_v46 = vcombine.low %v7252_v40, %v7513_v22  ;;  %v1315_v26 = vrot.slane %v5153_v23, 1 }
  0x64   : > { %6040 = vmatprep.subr.bf16.mxu1 %v6664_v28  ;;  %v6696_v28 = vld [vmem:[%s8930_s1 + $0x3d8] sm:$0xff]  }
  0x65   : > { %1124 = vmatmul.mubr.bf16.gmra.mxu0 %v849_v25  ;;  %v6695_v25 = vld [vmem:[%s8930_s1 + $0x358] sm:$0xff]   ;;  %v1316_v32 = vsel %vm1294_vm1, %v1307_v37, %v1315_v26 }
  0x66   : > { %1189 = vmatmul.mubr.bf16.gmra.mxu1 %v855_v51  ;;  %6001 = vmatpush3.bf16.msra.mxu0 %v6665_v30  ;;  %v1317_v51 = vrot.slane %v5154_v21, 1  ;;  %v1321_v30 = vrot.slane %v5156_v24, 1 }
  0x67   : > { %6041 = vmatpush3.bf16.msra.mxu1 %v6666_v31  ;;  %6002 = vmatprep.subr.bf16.mxu0 %v6667_v34  ;;  %v1319_v31 = vrot.slane %v5155_v46, 1  ;;  %v6698_v34 = vld [vmem:[%s8930_s1 + $0x398] sm:$0xff]  }
  0x68   : > { %6042 = vmatprep.subr.bf16.mxu1 %v6668_v41  ;;  %1563 = vmatprep.mubr.bf16.mxu0 %v1300_v36  ;;  %v1318_v40 = vsel %vm1294_vm1, %v1309_v43, %v1317_v51  ;;  %v1322_v38 = vsel %vm1294_vm1, %v1313_v58, %v1321_v30  ;;  %v6707_v43 = vld [vmem:[%s8930_s1 + $0x340] sm:$0xff]   ;;  %v1670_v58 = vld [vmem:[%s7081_s27 + $0x18] sm:$0xff] }
  0x69   : > { %1628 = vmatprep.mubr.bf16.mxu1 %v1306_v2  ;;  %v1320_v41 = vsel %vm1294_vm1, %v1311_v12, %v1319_v31  ;;  %v1674_v36 = vld [vmem:[%s7081_s27 + $0x38] sm:$0xff] }
  0x6a   : > { %6003 = vmatpush3.bf16.msra.mxu0 %v6669_v49  ;;  %v6702_v49 = vld [vmem:[%s8930_s1 + $0x390] sm:$0xff]  }
  0x6b   : > { %6043 = vmatpush3.bf16.msra.mxu1 %v6670_v47  ;;  %6068 = vmatprep.subr.bf16.mxu0 %v6675_v54  ;;  %v6704_v47 = vld [vmem:[%s8930_s1 + $0x3c8] sm:$0xff]   ;;  %v7579_v54 = vld [vmem:[%s7081_s27 + $0x20] sm:$0xff] }
  0x6c   : > { %6108 = vmatprep.subr.bf16.mxu1 %v6676_v57  ;;  %v1673_v57 = vld [vmem:[%s7081_s27 + $0x30] sm:$0xff]  ;;  %v5253_v60 = vcombine.low %v1669_v56, %v7579_v54  ;;  %v5254_v62 = vcombine.high %v1669_v56, %v7579_v54 }
  0x6d   : > { %1564 = vmatmul.mubr.bf16.vlgmr.msra.gmra.mxu0 %v1297_v3  ;;  %v7586_v0 = vcombine.low %v1673_v57, %v7189_v6  ;;  %v7589_v1 = vcombine.high %v1673_v57, %v7189_v6  ;;  %v7666_v57 = vld [vmem:[%s7081_s27 + $0x58] ss:$16 sps:$4 sm:$0xff]  }
  0x6e   : > { %1629 = vmatmul.mubr.bf16.vlgmr.msra.gmra.mxu1 %v1303_v4  ;;  %6069 = vmatpush3.bf16.msra.mxu0 %v6677_v33  ;;  %v7592_v33 = vld [vmem:[%s7081_s27 + $0x28] sm:$0xff]  ;;  %v7598_v4 = vcombine.low %v1674_v36, %v7195_v10  ;;  %v1827_v6 = vshrl.u32 %v5254_v62, 16 }
  0x6f   : > { %6109 = vmatpush3.bf16.msra.mxu1 %v6678_v5  ;;  %6070 = vmatprep.subr.bf16.mxu0 %v6679_v7  ;;  %v5255_v2 = vcombine.low %v1670_v58, %v7592_v33  ;;  %v5256_v3 = vcombine.high %v1670_v58, %v7592_v33  ;;  %v7601_v5 = vcombine.high %v1674_v36, %v7195_v10  ;;  %v6719_v7 = vld [vmem:[%s8930_s1 + $0x478] sm:$0xff]   ;;  %v6733_v58 = vld [vmem:[%s8930_s1 + $0x468] sm:$0xff]  }
  0x70   : > { %6110 = vmatprep.subr.bf16.mxu1 %v6680_v8  ;;  %1571 = vmatprep.mubr.bf16.mxu0 %v1310_v9  ;;  %v1829_v8 = vshll.u32 %v5254_v62, 16  ;;  %v1834_v9 = vshll.u32 %v7589_v1, 16  ;;  %v6720_v10 = vld [vmem:[%s8930_s1 + $0x4f8] sm:$0xff]   ;;  %v1846_v23 = vshll.u32 %v7598_v4, 16 }
  0x71   : > { %1636 = vmatprep.mubr.bf16.mxu1 %v1314_v11  ;;  %v1815_v11 = vshrl.u32 %v5253_v60, 16  ;;  %v1851_v37 = vshrl.u32 %v5256_v3, 16  ;;  %v1858_v12 = vshll.u32 %v7601_v5, 16 }
  0x72   : > { %6071 = vmatpush3.bf16.msra.mxu0 %v6681_v50  ;;  %v1853_v50 = vshll.u32 %v5256_v3, 16 }
  0x73   : > { %6111 = vmatpush3.bf16.msra.mxu1 %v6682_v44  ;;  %6072 = vmatprep.subr.bf16.mxu0 %v6683_v17  ;;  %v1817_v44 = vshll.u32 %v5253_v60, 16  ;;  %v1831_v17 = vrot.slane %v1829_v8, 1  ;;  %v6734_v8 = vld [vmem:[%s8930_s1 + $0x4e8] sm:$0xff]  }
  0x74   : > { %6112 = vmatprep.subr.bf16.mxu1 %v6684_v61  ;;  %v1836_v61 = vrot.slane %v1834_v9, 1 }
  0x75   : > { %1572 = vmatmul.mubr.bf16.gmra.mxu0 %v1308_v18  ;;  %v1822_v18 = vshll.u32 %v7586_v0, 16 }
  0x76   : > { %1637 = vmatmul.mubr.bf16.gmra.mxu1 %v1312_v13  ;;  %6073 = vmatpush3.bf16.msra.mxu0 %v6685_v39  ;;  %v1839_v13 = vshrl.u32 %v5255_v2, 16  ;;  %v1855_v39 = vrot.slane %v1853_v50, 1 }
  0x77   : > { %6113 = vmatpush3.bf16.msra.mxu1 %v6686_v59  ;;  %6074 = vmatprep.subr.bf16.mxu0 %v6687_v48  ;;  %v1860_v59 = vrot.slane %v1858_v12, 1  ;;  %v1819_v48 = vrot.slane %v1817_v44, 1  ;;  %v1824_v21 = vrot.slane %v1822_v18, 1 }
  0x78   : > { %6114 = vmatprep.subr.bf16.mxu1 %v6688_v63  ;;  %1579 = vmatprep.mubr.bf16.mxu0 %v1318_v40  ;;  %v1841_v63 = vshll.u32 %v5255_v2, 16  ;;  %v1856_v24 = vor.u32 %v1855_v39, %v1851_v37  ;;  %v6737_v39 = vld [vmem:[%s8930_s1 + $0x460] sm:$0xff]  }
  0x79   : > { %1644 = vmatprep.mubr.bf16.mxu1 %v1322_v38  ;;  %v1820_v46 = vor.u32 %v1819_v48, %v1815_v11  ;;  %v1870_v38 = vshrl.u32 %v7589_v1, 16  ;;  %v6735_v11 = vld [vmem:[%s8930_s1 + $0x428] sm:$0xff]  }
  0x7a   : > { %6075 = vmatpush3.bf16.msra.mxu0 %v6689_v14  ;;  %v6721_v14 = vld [vmem:[%s8930_s1 + $0x438] sm:$0xff]  }
  0x7b   : > { %6115 = vmatpush3.bf16.msra.mxu1 %v6690_v19  ;;  %6076 = vmatprep.subr.bf16.mxu0 %v6695_v25  ;;  %v1832_v19 = vor.u32 %v1831_v17, %v1827_v6  ;;  %v1843_v25 = vrot.slane %v1841_v63, 1  ;;  %v1882_v6 = vshll.u32 %v7666_v57, 16  ;;  %v6736_v17 = vld [vmem:[%s8930_s1 + $0x4a8] sm:$0xff]   ;;  %v6738_v63 = vld [vmem:[%s8930_s1 + $0x4e0] sm:$0xff]  }
  0x7c   : > { %6116 = vmatprep.subr.bf16.mxu1 %v6696_v28  ;;  %v1848_v28 = vrot.slane %v1846_v23, 1 }
  0x7d   : > { %1580 = vmatmul.mubr.bf16.gmra.mxu0 %v1316_v32  ;;  %v1844_v40 = vor.u32 %v1843_v25, %v1839_v13  ;;  %v6724_v32 = vld [vmem:[%s8930_s1 + $0x4f0] sm:$0xff]   ;;  %v1683_v25 = vld [vmem:[%s7081_s27 + $0x80] sm:$0x77] }
  0x7e   : > { %1645 = vmatmul.mubr.bf16.gmra.mxu1 %v1320_v41  ;;  %6077 = vmatpush3.bf16.msra.mxu0 %v6697_v35  ;;  %v6723_v35 = vld [vmem:[%s8930_s1 + $0x470] sm:$0xff]  }
  0x7f   : > { %6117 = vmatpush3.bf16.msra.mxu1 %v6698_v34  ;;  %6078 = vmatprep.subr.bf16.mxu0 %v6699_v15  ;;  %v6725_v34 = vld [vmem:[%s8930_s1 + $0x430] sm:$0xff]   ;;  %v1849_v41 = vsel %vm734_vm0, %v1844_v40, %v1848_v28 }
  0x80   : > { %6118 = vmatprep.subr.bf16.mxu1 %v6700_v42  ;;  %1587 = vmatprep.mubr.bf16.mxu0 %v1317_v51  ;;  %v6722_v51 = vld [vmem:[%s8930_s1 + $0x4b8] sm:$0xff]   ;;  %v6726_v15 = vld [vmem:[%s8930_s1 + $0x4b0] sm:$0xff]   ;;  %v1886_v42 = vshrl.u32 %v7601_v5, 16 }
  0x81   : > { %1652 = vmatprep.mubr.bf16.mxu1 %v1321_v30  ;;  %v1861_v30 = vsel %vm734_vm0, %v1856_v24, %v1860_v59  ;;  %v6740_v24 = vld [vmem:[%s8930_s1 + $0x4a0] sm:$0xff]  }
  0x82   : > { %6079 = vmatpush3.bf16.msra.mxu0 %v6701_v16  ;;  %v1862_v16 = vshrl.u32 %v7586_v0, 16  ;;  %v1888_v60 = vor.u32 %v1886_v42, %v1860_v59 }
  0x83   : > { %6119 = vmatpush3.bf16.msra.mxu1 %v6702_v49  ;;  %6080 = vmatprep.subr.bf16.mxu0 %v6703_v45  ;;  %v1878_v49 = vshrl.u32 %v7598_v4, 16  ;;  %v7648_v45 = vld [vmem:[%s7081_s27 + $0x54] ss:$16 sps:$4 sm:$0xff]  }
  0x84   : > { %6120 = vmatprep.subr.bf16.mxu1 %v6704_v47  ;;  %v2377_v47 = vrot.slane %v7589_v1, 1  ;;  %v1874_v56 = vshll.u32 %v7648_v45, 16  ;;  %v1864_v36 = vor.u32 %v1862_v16, %v1824_v21  ;;  %v1902_v59 = vshrl.u32 %v7648_v45, 16  ;;  %v6773_v1 = vld [vmem:[%s8930_s1 + $0x568] sm:$0xff]  }
  0x85   : > { %1588 = vmatmul.mubr.bf16.gmra.mxu0 %v1315_v26  ;;  %v1837_v26 = vsel %vm734_vm0, %v1832_v19, %v1836_v61  ;;  %v6739_v19 = vld [vmem:[%s8930_s1 + $0x420] sm:$0xff]  }
  0x86   : > { %1653 = vmatmul.mubr.bf16.gmra.mxu1 %v1319_v31  ;;  %6081 = vmatpush3.bf16.msra.mxu0 %v6705_v52  ;;  %v1825_v31 = vsel %vm734_vm0, %v1820_v46, %v1824_v21  ;;  %v2383_v52 = vrot.slane %v7601_v5, 1  ;;  %v1876_v3 = vrot.slane %v1874_v56, 1  ;;  %v1910_v46 = vshrl.u32 %v7666_v57, 16  ;;  %v7913_v5 = vld [vmem:[%s7081_s27 + $0x88] sm:$0xff] }
  0x87   : > { %6121 = vmatpush3.bf16.msra.mxu1 %v6706_v27  ;;  %6082 = vmatprep.subr.bf16.mxu0 %v6707_v43  ;;  %v7653_v27 = vld [vmem:[%s7081_s27 + $0x5c] ss:$16 sps:$4 sm:$0xff]   ;;  %v7656_v43 = vld [vmem:[%s7081_s27 + $0x50] ss:$16 sps:$4 sm:$0xff]  }
  0x88   : > { %6122 = vmatprep.subr.bf16.mxu1 %v6708_v55  ;;  %2178 = vmatprep.mubr.bf16.mxu0 %v1837_v26  ;;  %v7658_v55 = vrot.slane %v1862_v16, 1  ;;  %v1890_v62 = vshll.u32 %v7653_v27, 16  ;;  %v1866_v2 = vshll.u32 %v7656_v43, 16  ;;  %v1894_v21 = vshrl.u32 %v7656_v43, 16 }
  0x89   : > { %2243 = vmatprep.mubr.bf16.mxu1 %v1861_v30  ;;  %v5266_v26 = vcombine.high %v7508_v20, %v1683_v25  ;;  %v1904_v40 = vor.u32 %v1902_v59, %v1876_v3 }
  0x8a   : > { %6083 = vmatpush3.bf16.msra.mxu0 %v6709_v53  ;;  %v7660_v53 = vrot.slane %v1878_v49, 1  ;;  %v1892_v37 = vrot.slane %v1890_v62, 1  ;;  %v1868_v50 = vrot.slane %v1866_v2, 1 }
  0x8b   : > { %6123 = vmatpush3.bf16.msra.mxu1 %v6710_v29  ;;  %6148 = vmatprep.subr.bf16.mxu0 %v6719_v7  ;;  %v1872_v29 = vor.u32 %v1870_v38, %v1836_v61  ;;  %v1880_v7 = vor.u32 %v1878_v49, %v1848_v28  ;;  %v1906_v16 = vshll.u32 %v5266_v26, 16 }
  0x8c   : > { %6188 = vmatprep.subr.bf16.mxu1 %v6720_v10  ;;  %v1884_v10 = vrot.slane %v1882_v6, 1  ;;  %v1893_v61 = vsel %vm734_vm0, %v1888_v60, %v1892_v37  ;;  %v1869_v13 = vsel %vm734_vm0, %v1864_v36, %v1868_v50  ;;  %v6747_v60 = vld [vmem:[%s8930_s1 + $0x418] sm:$0xff]   ;;  %v1929_v36 = vshrl.u32 %v5266_v26, 16 }
  0x8d   : > { %2179 = vmatmul.mubr.bf16.vlgmr.msra.gmra.mxu0 %v1825_v31  ;;  %v1877_v44 = vsel %vm734_vm0, %v1872_v29, %v1876_v3  ;;  %v6745_v31 = vld [vmem:[%s8930_s1 + $0x458] sm:$0xff]   ;;  %v1908_v3 = vrot.slane %v1906_v16, 1  ;;  %v2391_v16 = vrot.slane %v7653_v27, 1 }
  0x8e   : > { %6149 = vmatpush3.bf16.msra.mxu0 %v6721_v14  ;;  %2244 = vmatmul.mubr.bf16.vlgmr.msra.gmra.mxu1 %v1849_v41  ;;  %v1885_v48 = vsel %vm734_vm0, %v1880_v7, %v1884_v10  ;;  %v1918_v14 = vshrl.u32 %v7653_v27, 16  ;;  %v1912_v41 = vor.u32 %v1910_v46, %v1884_v10  ;;  %v6798_v27 = vld [vmem:[%s8930_s1 + $0x5c0] sm:$0xff]  }
  0x8f   : > { %6150 = vmatprep.subr.bf16.mxu0 %v6723_v35  ;;  %6189 = vmatpush3.bf16.msra.mxu1 %v6722_v51  ;;  %v1684_v51 = vld [vmem:[%s7081_s27 + $0x88] sm:$0x77]  ;;  %v5265_v35 = vcombine.low %v7508_v20, %v1683_v25 }
  0x90   : > { %6190 = vmatprep.subr.bf16.mxu1 %v6724_v32  ;;  %2186 = vmatprep.mubr.bf16.mxu0 %v1877_v44  ;;  %v5268_v28 = vcombine.high %v7513_v22, %v1684_v51  ;;  %v5267_v30 = vcombine.low %v7513_v22, %v1684_v51  ;;  %v1920_v32 = vor.u32 %v1918_v14, %v1892_v37  ;;  %v6748_v37 = vld [vmem:[%s8930_s1 + $0x498] sm:$0xff]   ;;  %v6753_v51 = vld [vmem:[%s8930_s1 + $0x448] sm:$0xff]  }
  0x91   : > { %2251 = vmatprep.mubr.bf16.mxu1 %v1893_v61  ;;  %v1898_v29 = vshll.u32 %v5265_v35, 16  ;;  %v1909_v44 = vsel %vm734_vm0, %v1904_v40, %v1908_v3 }
  0x92   : > { %6151 = vmatpush3.bf16.msra.mxu0 %v6725_v34  ;;  %v1896_v34 = vor.u32 %v1894_v21, %v1868_v50  ;;  %v1922_v49 = vshll.u32 %v5268_v28, 16  ;;  %v6749_v50 = vld [vmem:[%s8930_s1 + $0x450] sm:$0xff]   ;;  %v1932_v25 = vshrl.u32 %v5267_v30, 16 }
  0x93   : > { %6152 = vmatprep.subr.bf16.mxu0 %v6733_v58  ;;  %6191 = vmatpush3.bf16.msra.mxu1 %v6726_v15  ;;  %v6746_v15 = vld [vmem:[%s8930_s1 + $0x4d8] sm:$0xff]   ;;  %v1914_v58 = vshll.u32 %v5267_v30, 16  ;;  %v2380_v30 = vrot.slane %v7598_v4, 1  ;;  %v6793_v4 = vld [vmem:[%s8930_s1 + $0x548] sm:$0xff]  }
  0x94   : > { %6192 = vmatprep.subr.bf16.mxu1 %v6734_v8  ;;  %v1924_v7 = vrot.slane %v1922_v49, 1  ;;  %v1900_v8 = vrot.slane %v1898_v29, 1  ;;  %v6758_v49 = vld [vmem:[%s8930_s1 + $0x4c0] sm:$0xff]   ;;  %v2385_v29 = vrot.slane %v7656_v43, 1 }
  0x95   : > { %2187 = vmatmul.mubr.bf16.gmra.mxu0 %v1869_v13  ;;  %v6750_v13 = vld [vmem:[%s8930_s1 + $0x4d0] sm:$0xff]   ;;  %v6799_v43 = vld [vmem:[%s8930_s1 + $0x500] sm:$0xff]  }
  0x96   : > { %6153 = vmatpush3.bf16.msra.mxu0 %v6735_v11  ;;  %2252 = vmatmul.mubr.bf16.gmra.mxu1 %v1885_v48  ;;  %v1916_v11 = vrot.slane %v1914_v58, 1  ;;  %v1925_v10 = vsel %vm734_vm0, %v1920_v32, %v1924_v7  ;;  %v1931_v48 = vor.u32 %v1929_v36, %v1908_v3  ;;  %v6759_v58 = vld [vmem:[%s8930_s1 + $0x400] sm:$0xff]   ;;  %v2284_v3 = vld [vmem:[%s7081_s27 + $0x10] sm:$0xee] }
  0x97   : > { %6154 = vmatprep.subr.bf16.mxu0 %v6737_v39  ;;  %6193 = vmatpush3.bf16.msra.mxu1 %v6736_v17  ;;  %v1901_v17 = vsel %vm734_vm0, %v1896_v34, %v1900_v8  ;;  %v6751_v39 = vld [vmem:[%s8930_s1 + $0x410] sm:$0xff]   ;;  %v6756_v34 = vld [vmem:[%s8930_s1 + $0x488] sm:$0xff]   ;;  %v6760_v36 = vld [vmem:[%s8930_s1 + $0x480] sm:$0xff]  }
  0x98   : > { %6194 = vmatprep.subr.bf16.mxu1 %v6738_v63  ;;  %v1917_v61 = vsel %vm734_vm0, %v1912_v41, %v1916_v11  ;;  %2194 = vmatprep.mubr.bf16.mxu0 %v1909_v44  ;;  %v1935_v63 = vshrl.u32 %v5268_v28, 16  ;;  %v6754_v28 = vld [vmem:[%s8930_s1 + $0x4c8] sm:$0xff]   ;;  %v1934_v32 = vor.u32 %v1932_v25, %v1916_v11  ;;  %v2387_v41 = vrot.slane %v7648_v45, 1 }
  0x99   : > { %2259 = vmatprep.mubr.bf16.mxu1 %v1925_v10  ;;  %v5366_v11 = vcombine.high %v2284_v3, %v7579_v54  ;;  %v6765_v10 = vld [vmem:[%s8930_s1 + $0x578] sm:$0xff]   ;;  %v6795_v45 = vld [vmem:[%s8930_s1 + $0x508] sm:$0xff]  }
  0x9a   : > { %6155 = vmatpush3.bf16.msra.mxu0 %v6739_v19  ;;  %v6752_v19 = vld [vmem:[%s8930_s1 + $0x490] sm:$0xff]   ;;  %v1937_v26 = vor.u32 %v1935_v63, %v1924_v7  ;;  %v7788_v7 = vrot.slane %v1870_v38, 1  ;;  %v7804_v38 = vrot.slane %v1834_v9, 2  ;;  %v6768_v63 = vld [vmem:[%s8930_s1 + $0x5b8] sm:$0xff]  }
  0x9b   : > { %6195 = vmatpush3.bf16.msra.mxu1 %v6740_v24  ;;  %6156 = vmatprep.subr.bf16.mxu0 %v6745_v31  ;;  %v1926_v24 = vshrl.u32 %v5265_v35, 16  ;;  %v2374_v31 = vrot.slane %v7586_v0, 1  ;;  %v6755_v35 = vld [vmem:[%s8930_s1 + $0x408] sm:$0xff]  }
  0x9c   : > { %6196 = vmatprep.subr.bf16.mxu1 %v6746_v15  ;;  %v6757_v15 = vld [vmem:[%s8930_s1 + $0x440] sm:$0xff]  }
  0x9d   : > { %2195 = vmatmul.mubr.bf16.gmra.mxu0 %v1901_v17  ;;  %v1928_v40 = vor.u32 %v1926_v24, %v1900_v8  ;;  %v7791_v8 = vcombine.low %v2284_v3, %v7579_v54  ;;  %v2376_v17 = vrot.slane %v5366_v11, 1  ;;  %v6766_v54 = vld [vmem:[%s8930_s1 + $0x5f8] sm:$0xff]  }
  0x9e   : > { %6157 = vmatpush3.bf16.msra.mxu0 %v6747_v60  ;;  %2260 = vmatmul.mubr.bf16.gmra.mxu1 %v1917_v61  ;;  %v2389_v60 = vrot.slane %v7666_v57, 1 }
  0x9f   : > { %6197 = vmatpush3.bf16.msra.mxu1 %v6748_v37  ;;  %6158 = vmatprep.subr.bf16.mxu0 %v6749_v50  ;;  %v2285_v37 = vld [vmem:[%s7081_s27 + $0x18] sm:$0xee]  ;;  %v2373_v61 = vrot.slane %v7791_v8, 1  ;;  %v2378_v9 = vsel %vm1294_vm1, %v2376_v17, %v2377_v47  ;;  %v6777_v17 = vld [vmem:[%s8930_s1 + $0x560] sm:$0xff]  }
  0xa0   : > { %6198 = vmatprep.subr.bf16.mxu1 %v6750_v13  ;;  %2202 = vmatprep.mubr.bf16.mxu0 %v1931_v48  ;;  %v7796_v50 = vcombine.low %v2285_v37, %v7592_v33  ;;  %v5368_v44 = vcombine.high %v2285_v37, %v7592_v33  ;;  %v6767_v13 = vld [vmem:[%s8930_s1 + $0x538] sm:$0xff]   ;;  %v2390_v37 = vsel %vm1294_vm1, %v2380_v30, %v2389_v60 }
  0xa1   : > { %2267 = vmatprep.mubr.bf16.mxu1 %v1937_v26  ;;  %v2375_v48 = vsel %vm1294_vm1, %v2373_v61, %v2374_v31  ;;  %v7834_v26 = vrot.slane %v1886_v42, 1  ;;  %v2392_v42 = vsel %vm1294_vm1, %v2383_v52, %v2391_v16  ;;  %v2817_v61 = vshll.u32 %v7791_v8, 16 }
  0xa2   : > { %6159 = vmatpush3.bf16.msra.mxu0 %v6751_v39  ;;  %v2382_v33 = vrot.slane %v5368_v44, 1  ;;  %v2379_v39 = vrot.slane %v7796_v50, 1 }
  0xa3   : > { %6199 = vmatpush3.bf16.msra.mxu1 %v6752_v19  ;;  %6160 = vmatprep.subr.bf16.mxu0 %v6753_v51  ;;  %v2826_v19 = vshrl.u32 %v5366_v11, 16  ;;  %v6769_v51 = vld [vmem:[%s8930_s1 + $0x570] sm:$0xff]  }
  0xa4   : > { %6200 = vmatprep.subr.bf16.mxu1 %v6754_v28  ;;  %v2384_v24 = vsel %vm1294_vm1, %v2382_v33, %v2383_v52  ;;  %v2381_v25 = vsel %vm1294_vm1, %v2379_v39, %v2380_v30  ;;  %v6770_v28 = vld [vmem:[%s8930_s1 + $0x5f0] sm:$0xff]   ;;  %v6774_v52 = vld [vmem:[%s8930_s1 + $0x5e8] sm:$0xff]   ;;  %v6778_v30 = vld [vmem:[%s8930_s1 + $0x5e0] sm:$0xff]  }
  0xa5   : > { %2203 = vmatmul.mubr.bf16.gmra.mxu0 %v1928_v40  ;;  %v6771_v40 = vld [vmem:[%s8930_s1 + $0x530] sm:$0xff]   ;;  %v6780_v33 = vld [vmem:[%s8930_s1 + $0x5a0] sm:$0xff]  }
  0xa6   : > { %6161 = vmatpush3.bf16.msra.mxu0 %v6755_v35  ;;  %2268 = vmatmul.mubr.bf16.gmra.mxu1 %v1934_v32  ;;  %v2829_v35 = vshll.u32 %v5366_v11, 16  ;;  %v2388_v32 = vsel %vm1294_vm1, %v2377_v47, %v2387_v41  ;;  %v2853_v47 = vshll.u32 %v5368_v44, 16  ;;  %v2386_v11 = vsel %vm1294_vm1, %v2374_v31, %v2385_v29  ;;  %v7902_v39 = vld [vmem:[%s7081_s27 + $0x80] sm:$0xff] }
  0xa7   : > { %6201 = vmatpush3.bf16.msra.mxu1 %v6756_v34  ;;  %6162 = vmatprep.subr.bf16.mxu0 %v6757_v15  ;;  %v7852_v34 = vrot.slane %v2826_v19, 1  ;;  %v6772_v15 = vld [vmem:[%s8930_s1 + $0x5b0] sm:$0xff]   ;;  %v2814_v31 = vshrl.u32 %v7791_v8, 16  ;;  %v7906_v8 = vrot.slane %v2817_v61, 2  ;;  %v7922_v19 = vcombine.high %v7513_v22, %v7913_v5 }
  0xa8   : > { %6202 = vmatprep.subr.bf16.mxu1 %v6758_v49  ;;  %2641 = vmatprep.mubr.bf16.mxu0 %v2378_v9  ;;  %v2850_v49 = vshrl.u32 %v5368_v44, 16  ;;  %v6776_v44 = vld [vmem:[%s8930_s1 + $0x5a8] sm:$0xff]  }
  0xa9   : > { %2706 = vmatprep.mubr.bf16.mxu1 %v2384_v24  ;;  %v7904_v9 = vrot.slane %v2814_v31, 1  ;;  %v7926_v24 = vcombine.low %v7513_v22, %v7913_v5  ;;  %v6787_v22 = vld [vmem:[%s8930_s1 + $0x518] sm:$0xff]   ;;  %v2870_v31 = vrot.slane %v1882_v6, 2 }
  0xaa   : > { %6163 = vmatpush3.bf16.msra.mxu0 %v6759_v58  ;;  %v7863_v58 = vrot.slane %v2829_v35, 2  ;;  %v7868_v3 = vrot.slane %v2850_v49, 1  ;;  %v6786_v35 = vld [vmem:[%s8930_s1 + $0x5d8] sm:$0xff]  }
  0xab   : > { %6203 = vmatpush3.bf16.msra.mxu1 %v6760_v36  ;;  %6228 = vmatprep.subr.bf16.mxu0 %v6765_v10  ;;  %v6775_v36 = vld [vmem:[%s8930_s1 + $0x528] sm:$0xff]   ;;  %v7883_v10 = vrot.slane %v2853_v47, 2  ;;  %v2397_v0 = vrot.slane %v7926_v24, 1  ;;  %v6790_v47 = vld [vmem:[%s8930_s1 + $0x5d0] sm:$0xff]  }
  0xac   : > { %6268 = vmatprep.subr.bf16.mxu1 %v6766_v54  ;;  %v6779_v54 = vld [vmem:[%s8930_s1 + $0x520] sm:$0xff]  }
  0xad   : > { %2642 = vmatmul.mubr.bf16.vlgmr.msra.gmra.mxu0 %v2375_v48  ;;  %v7910_v48 = vcombine.high %v7508_v20, %v7902_v39 }
  0xae   : > { %2707 = vmatmul.mubr.bf16.vlgmr.msra.gmra.mxu1 %v2381_v25  ;;  %6229 = vmatpush3.bf16.msra.mxu0 %v6767_v13  ;;  %v2858_v13 = vrot.slane %v1858_v12, 2  ;;  %v7917_v12 = vcombine.low %v7508_v20, %v7902_v39  ;;  %v6785_v25 = vld [vmem:[%s8930_s1 + $0x558] sm:$0xff]  }
  0xaf   : > { %6269 = vmatpush3.bf16.msra.mxu1 %v6768_v63  ;;  %6230 = vmatprep.subr.bf16.mxu0 %v6769_v51  ;;  %v2838_v63 = vshrl.u32 %v7796_v50, 16  ;;  %v7933_v51 = vrot.slane %v1822_v18, 2  ;;  %v2395_v20 = vrot.slane %v7910_v48, 1 }
  0xb0   : > { %6270 = vmatprep.subr.bf16.mxu1 %v6770_v28  ;;  %2649 = vmatprep.mubr.bf16.mxu0 %v2388_v32  ;;  %v2393_v28 = vrot.slane %v7917_v12, 1 }
  0xb1   : > { %2714 = vmatprep.mubr.bf16.mxu1 %v2392_v42  ;;  %v2396_v18 = vsel %vm1294_vm1, %v2387_v41, %v2395_v20  ;;  %v6788_v42 = vld [vmem:[%s8930_s1 + $0x598] sm:$0xff]   ;;  %v2398_v41 = vsel %vm1294_vm1, %v2389_v60, %v2397_v0 }
  0xb2   : > { %6231 = vmatpush3.bf16.msra.mxu0 %v6771_v40  ;;  %v2399_v40 = vrot.slane %v7922_v19, 1  ;;  %v2394_v32 = vsel %vm1294_vm1, %v2385_v29, %v2393_v28  ;;  %v6789_v29 = vld [vmem:[%s8930_s1 + $0x550] sm:$0xff]  }
  0xb3   : > { %6271 = vmatpush3.bf16.msra.mxu1 %v6772_v15  ;;  %6232 = vmatprep.subr.bf16.mxu0 %v6773_v1  ;;  %v7954_v15 = vrot.slane %v2838_v63, 1  ;;  %v2841_v1 = vshll.u32 %v7796_v50, 16  ;;  %v6792_v50 = vld [vmem:[%s8930_s1 + $0x590] sm:$0xff]   ;;  %v6803_v63 = vld [vmem:[%s8930_s1 + $0x638] sm:$0xff]  }
  0xb4   : > { %6272 = vmatprep.subr.bf16.mxu1 %v6774_v52  ;;  %v2400_v49 = vsel %vm1294_vm1, %v2391_v16, %v2399_v40  ;;  %v2846_v52 = vrot.slane %v1846_v23, 2  ;;  %v6791_v16 = vld [vmem:[%s8930_s1 + $0x510] sm:$0xff]   ;;  %v7986_v23 = vor.u32 %v7804_v38, %v7788_v7  ;;  %v2873_v7 = vrot.slane %v1918_v14, 1  ;;  %v6796_v38 = vld [vmem:[%s8930_s1 + $0x588] sm:$0xff]   ;;  %v6797_v14 = vld [vmem:[%s8930_s1 + $0x540] sm:$0xff]  }
  0xb5   : > { %2650 = vmatmul.mubr.bf16.gmra.mxu0 %v2386_v11  ;;  %v7974_v60 = vrot.slane %v2841_v1, 2  ;;  %v2866_v11 = vrot.slane %v1874_v56, 2  ;;  %v2874_v56 = vrot.slane %v1890_v62, 2  ;;  %v2881_v1 = vshll.u32 %v7917_v12, 16 }
  0xb6   : > { %2715 = vmatmul.mubr.bf16.gmra.mxu1 %v2390_v37  ;;  %6233 = vmatpush3.bf16.msra.mxu0 %v6775_v36  ;;  %v2865_v36 = vrot.slane %v1902_v59, 1  ;;  %v6794_v37 = vld [vmem:[%s8930_s1 + $0x5c8] sm:$0xff]   ;;  %v2832_v59 = vor.u32 %v7863_v58, %v7852_v34  ;;  %v2862_v34 = vrot.slane %v1866_v2, 2  ;;  %v2820_v2 = vor.u32 %v7906_v8, %v7904_v9 }
  0xb7   : > { %6273 = vmatpush3.bf16.msra.mxu1 %v6776_v44  ;;  %6234 = vmatprep.subr.bf16.mxu0 %v6777_v17  ;;  %v2856_v44 = vor.u32 %v7883_v10, %v7868_v3  ;;  %v2859_v17 = vor.u32 %v2858_v13, %v7834_v26  ;;  %v2861_v26 = vrot.slane %v1894_v21, 1  ;;  %v2869_v21 = vrot.slane %v1910_v46, 1  ;;  %v6800_v46 = vld [vmem:[%s8930_s1 + $0x580] sm:$0xff]  }
  0xb8   : > { %6274 = vmatprep.subr.bf16.mxu1 %v6778_v30  ;;  %2657 = vmatprep.mubr.bf16.mxu0 %v2396_v18  ;;  %v2836_v62 = vsel %vm2812_vm2, %v2832_v59, %v7986_v23  ;;  %v2823_v3 = vor.u32 %v7933_v51, %v7658_v55  ;;  %v2844_v30 = vor.u32 %v7974_v60, %v7954_v15  ;;  %v6801_v55 = vld [vmem:[%s8930_s1 + $0x678] sm:$0xff]   ;;  %v2890_v13 = vshll.u32 %v7910_v48, 16  ;;  %v6811_v60 = vld [vmem:[%s8930_s1 + $0x628] sm:$0xff]  }
  0xb9   : > { %2722 = vmatprep.mubr.bf16.mxu1 %v2400_v49  ;;  %v2860_v58 = vsel %vm2812_vm2, %v2856_v44, %v2859_v17  ;;  %v8030_v10 = vor.u32 %v2862_v34, %v2861_v26  ;;  %v2847_v61 = vor.u32 %v2846_v52, %v7660_v53  ;;  %v8046_v6 = vor.u32 %v2870_v31, %v2869_v21  ;;  %v6802_v53 = vld [vmem:[%s8930_s1 + $0x6f8] sm:$0xff]  }
  0xba   : > { %6235 = vmatpush3.bf16.msra.mxu0 %v6779_v54  ;;  %v2887_v54 = vshrl.u32 %v7910_v48, 16  ;;  %v2824_v8 = vsel %vm2812_vm2, %v2820_v2, %v2823_v3  ;;  %v6817_v34 = vld [vmem:[%s8930_s1 + $0x658] sm:$0xff]  }
  0xbb   : > { %6275 = vmatpush3.bf16.msra.mxu1 %v6780_v33  ;;  %6236 = vmatprep.subr.bf16.mxu0 %v6785_v25  ;;  %v2864_v57 = vsel %vm2812_vm2, %v2823_v3, %v8030_v10  ;;  %v2867_v33 = vor.u32 %v2866_v11, %v2865_v36  ;;  %v2875_v25 = vor.u32 %v2874_v56, %v2873_v7  ;;  %v2883_v36 = vrot.slane %v2881_v1, 2  ;;  %v6819_v2 = vld [vmem:[%s8930_s1 + $0x618] sm:$0xff]   ;;  %v6832_v1 = vld [vmem:[%s8930_s1 + $0x680] sm:$0xff]  }
  0xbc   : > { %6276 = vmatprep.subr.bf16.mxu1 %v6786_v35  ;;  %v2889_v9 = vrot.slane %v2887_v54, 1  ;;  %v2872_v51 = vsel %vm2812_vm2, %v2847_v61, %v8046_v6  ;;  %v2848_v48 = vsel %vm2812_vm2, %v2844_v30, %v2847_v61  ;;  %v2905_v35 = vshrl.u32 %v7922_v19, 16  ;;  %v6820_v30 = vld [vmem:[%s8930_s1 + $0x698] sm:$0xff]  }
  0xbd   : > { %2658 = vmatmul.mubr.bf16.gmra.mxu0 %v2394_v32  ;;  %v2868_v18 = vsel %vm2812_vm2, %v7986_v23, %v2867_v33  ;;  %v2876_v15 = vsel %vm2812_vm2, %v2859_v17, %v2875_v25  ;;  %v6813_v23 = vld [vmem:[%s8930_s1 + $0x660] sm:$0xff]   ;;  %v2899_v11 = vshll.u32 %v7926_v24, 16 }
  0xbe   : > { %2723 = vmatmul.mubr.bf16.gmra.mxu1 %v2398_v41  ;;  %6237 = vmatpush3.bf16.msra.mxu0 %v6787_v22  ;;  %v6805_v22 = vld [vmem:[%s8930_s1 + $0x670] sm:$0xff]   ;;  %v2907_v32 = vrot.slane %v2905_v35, 1  ;;  %v2878_v41 = vshrl.u32 %v7917_v12, 16  ;;  %v6812_v12 = vld [vmem:[%s8930_s1 + $0x6a8] sm:$0xff]   ;;  %v6815_v17 = vld [vmem:[%s8930_s1 + $0x620] sm:$0xff]  }
  0xbf   : > { %6277 = vmatpush3.bf16.msra.mxu1 %v6788_v42  ;;  %6238 = vmatprep.subr.bf16.mxu0 %v6789_v29  ;;  %v6807_v42 = vld [vmem:[%s8930_s1 + $0x630] sm:$0xff]   ;;  %v6809_v29 = vld [vmem:[%s8930_s1 + $0x668] sm:$0xff]   ;;  %v2901_v56 = vrot.slane %v2899_v11, 2 }
  0xc0   : > { %6278 = vmatprep.subr.bf16.mxu1 %v6790_v47  ;;  %2665 = vmatprep.mubr.bf16.mxu0 %v2395_v20  ;;  %v2892_v20 = vrot.slane %v2890_v13, 2  ;;  %v6810_v47 = vld [vmem:[%s8930_s1 + $0x6e8] sm:$0xff]  }
  0xc1   : > { %2730 = vmatprep.mubr.bf16.mxu1 %v2399_v40  ;;  %v2908_v40 = vshll.u32 %v7922_v19, 16  ;;  %v6808_v19 = vld [vmem:[%s8930_s1 + $0x6b0] sm:$0xff]  }
  0xc2   : > { %6239 = vmatpush3.bf16.msra.mxu0 %v6791_v16  ;;  %v2893_v52 = vor.u32 %v2892_v20, %v2889_v9  ;;  %v2880_v16 = vrot.slane %v2878_v41, 1  ;;  %v6824_v9 = vld [vmem:[%s8930_s1 + $0x690] sm:$0xff]   ;;  %v6826_v20 = vld [vmem:[%s8930_s1 + $0x6c8] sm:$0xff]  }
  0xc3   : > { %6279 = vmatpush3.bf16.msra.mxu1 %v6792_v50  ;;  %6240 = vmatprep.subr.bf16.mxu0 %v6793_v4  ;;  %v2910_v49 = vrot.slane %v2908_v40, 2  ;;  %v2896_v4 = vshrl.u32 %v7926_v24, 16 }
  0xc4   : > { %6280 = vmatprep.subr.bf16.mxu1 %v6794_v37  ;;  %v6814_v37 = vld [vmem:[%s8930_s1 + $0x6e0] sm:$0xff]   ;;  %v2894_v59 = vsel %vm2812_vm2, %v2867_v33, %v2893_v52 }
  0xc5   : > { %2666 = vmatmul.mubr.bf16.gmra.mxu0 %v2393_v28  ;;  %v6804_v28 = vld [vmem:[%s8930_s1 + $0x6b8] sm:$0xff]   ;;  %v8090_v50 = vor.u32 %v2910_v49, %v2907_v32  ;;  %v2898_v44 = vrot.slane %v2896_v4, 1 }
  0xc6   : > { %2731 = vmatmul.mubr.bf16.gmra.mxu1 %v2397_v0  ;;  %6241 = vmatpush3.bf16.msra.mxu0 %v6795_v45  ;;  %v6806_v0 = vld [vmem:[%s8930_s1 + $0x6f0] sm:$0xff]   ;;  %v2884_v45 = vor.u32 %v2883_v36, %v2880_v16 }
  0xc7   : > { %6281 = vmatpush3.bf16.msra.mxu1 %v6796_v38  ;;  %6242 = vmatprep.subr.bf16.mxu0 %v6797_v14  ;;  %v2912_v7 = vsel %vm2812_vm2, %v2875_v25, %v8090_v50  ;;  %v6816_v38 = vld [vmem:[%s8930_s1 + $0x6a0] sm:$0xff]   ;;  %v2902_v14 = vor.u32 %v2901_v56, %v2898_v44  ;;  %v8195_v56 = vld [vmem:[%s7081_s27 + $0x4c] ss:$16 sps:$4 sm:$0xff]  }
  0xc8   : > { %6282 = vmatprep.subr.bf16.mxu1 %v6798_v27  ;;  %3153 = vmatprep.mubr.bf16.mxu0 %v2836_v62  ;;  %v6818_v62 = vld [vmem:[%s8930_s1 + $0x6d8] sm:$0xff]   ;;  %v8172_v16 = vld [vmem:[%s7081_s27 + $0x20] ss:$16 sps:$4 sm:$0xfe]  }
  0xc9   : > { %3218 = vmatprep.mubr.bf16.mxu1 %v2860_v58  ;;  %v8178_v36 = vld [vmem:[%s7081_s27 + $0x40] ss:$16 sps:$4 sm:$0xff]  }
  0xca   : > { %6243 = vmatpush3.bf16.msra.mxu0 %v6799_v43  ;;  %v2885_v43 = vsel %vm2812_vm2, %v8030_v10, %v2884_v45  ;;  %v6821_v10 = vld [vmem:[%s8930_s1 + $0x650] sm:$0xff]  }
  0xcb   : > { %6283 = vmatpush3.bf16.msra.mxu1 %v6800_v46  ;;  %6308 = vmatprep.subr.bf16.mxu0 %v6801_v55  ;;  %v2903_v46 = vsel %vm2812_vm2, %v8046_v6, %v2902_v14 }
  0xcc   : > { %6348 = vmatprep.subr.bf16.mxu1 %v6802_v53  ;;  %v6823_v53 = vld [vmem:[%s8930_s1 + $0x610] sm:$0xff]  }
  0xcd   : > { %3154 = vmatmul.mubr.bf16.vlgmr.msra.gmra.mxu0 %v2824_v8  ;;  %v6825_v8 = vld [vmem:[%s8930_s1 + $0x648] sm:$0xff]  }
  0xce   : > { %3219 = vmatmul.mubr.bf16.vlgmr.msra.gmra.mxu1 %v2848_v48  ;;  %6309 = vmatpush3.bf16.msra.mxu0 %v6803_v63  ;;  %v6827_v48 = vld [vmem:[%s8930_s1 + $0x608] sm:$0xff]  }
  0xcf   : > { %6349 = vmatpush3.bf16.msra.mxu1 %v6804_v28  ;;  %6310 = vmatprep.subr.bf16.mxu0 %v6805_v22  ;;  %v6828_v22 = vld [vmem:[%s8930_s1 + $0x688] sm:$0xff]  }
  0xd0   : > { %6350 = vmatprep.subr.bf16.mxu1 %v6806_v0  ;;  %3161 = vmatprep.mubr.bf16.mxu0 %v2868_v18  ;;  %v6829_v18 = vld [vmem:[%s8930_s1 + $0x640] sm:$0xff]  }
  0xd1   : > { %3226 = vmatprep.mubr.bf16.mxu1 %v2876_v15  ;;  %v6830_v15 = vld [vmem:[%s8930_s1 + $0x6c0] sm:$0xff]  }
  0xd2   : > { %6311 = vmatpush3.bf16.msra.mxu0 %v6807_v42 }
  0xd3   : > { %6351 = vmatpush3.bf16.msra.mxu1 %v6808_v19  ;;  %6312 = vmatprep.subr.bf16.mxu0 %v6809_v29  ;;  %v6831_v19 = vld [vmem:[%s8930_s1 + $0x600] sm:$0xff]  }
  0xd4   : > { %6352 = vmatprep.subr.bf16.mxu1 %v6810_v47 }
  0xd5   : > { %3162 = vmatmul.mubr.bf16.gmra.mxu0 %v2864_v57  ;;  %v6822_v57 = vld [vmem:[%s8930_s1 + $0x6d0] sm:$0xff]  }
  0xd6   : > { %3227 = vmatmul.mubr.bf16.gmra.mxu1 %v2872_v51  ;;  %6313 = vmatpush3.bf16.msra.mxu0 %v6811_v60  ;;  %v6835_v60 = vld [vmem:[%s7081_s27 + $0x24] ss:$16 sps:$4 sm:$0xfe]  }
  0xd7   : > { %6353 = vmatpush3.bf16.msra.mxu1 %v6812_v12  ;;  %6314 = vmatprep.subr.bf16.mxu0 %v6813_v23  ;;  %v8181_v12 = vld [vmem:[%s7081_s27 + $0x44] ss:$16 sps:$4 sm:$0xff]   ;;  %v3407_v4 = vrot.slane %v6835_v60, 1  ;;  %v3404_v23 = vrot.slane %v8172_v16, 1 }
  0xd8   : > { %6354 = vmatprep.subr.bf16.mxu1 %v6814_v37  ;;  %3169 = vmatprep.mubr.bf16.mxu0 %v2894_v59  ;;  %v3861_v59 = vshrl.u32 %v6835_v60, 16  ;;  %v3408_v44 = vrot.slane %v8181_v12, 1 }
  0xd9   : > { %3234 = vmatprep.mubr.bf16.mxu1 %v2912_v7  ;;  %v8189_v7 = vld [vmem:[%s7081_s27 + $0x48] ss:$16 sps:$4 sm:$0xff]  }
  0xda   : > { %6315 = vmatpush3.bf16.msra.mxu0 %v6815_v17  ;;  %v8186_v17 = vld [vmem:[%s7081_s27 + $0x28] ss:$16 sps:$4 sm:$0xfe]  }
  0xdb   : > { %6355 = vmatpush3.bf16.msra.mxu1 %v6816_v38  ;;  %6316 = vmatprep.subr.bf16.mxu0 %v6817_v34  ;;  %v3410_v34 = vrot.slane %v8186_v17, 1 }
  0xdc   : > { %6356 = vmatprep.subr.bf16.mxu1 %v6818_v62 }
  0xdd   : > { %3170 = vmatmul.mubr.bf16.gmra.mxu0 %v2885_v43 }
  0xde   : > { %3235 = vmatmul.mubr.bf16.gmra.mxu1 %v2903_v46  ;;  %6317 = vmatpush3.bf16.msra.mxu0 %v6819_v2  ;;  %v6845_v2 = vld [vmem:[%s8930_s1 + $0x778] sm:$0xff]  }
  0xdf   : > { %6357 = vmatpush3.bf16.msra.mxu1 %v6820_v30  ;;  %6318 = vmatprep.subr.bf16.mxu0 %v6821_v10 }
  0xe0   : > { %6358 = vmatprep.subr.bf16.mxu1 %v6822_v57  ;;  %3177 = vmatprep.mubr.bf16.mxu0 %v2893_v52 }
  0xe1   : > { %3242 = vmatprep.mubr.bf16.mxu1 %v8090_v50 }
  0xe2   : > { %6319 = vmatpush3.bf16.msra.mxu0 %v6823_v53  ;;  %v6848_v53 = vld [vmem:[%s8930_s1 + $0x7b8] sm:$0xff]  }
  0xe3   : > { %6359 = vmatpush3.bf16.msra.mxu1 %v6824_v9  ;;  %6320 = vmatprep.subr.bf16.mxu0 %v6825_v8  ;;  %v3864_v8 = vshll.u32 %v6835_v60, 16  ;;  %v8259_v60 = vld [vmem:[%s7081_s27 + $0x60] ss:$16 sps:$4 sm:$0xff]  }
  0xe4   : > { %6360 = vmatprep.subr.bf16.mxu1 %v6826_v20  ;;  %v6850_v20 = vld [vmem:[%s8930_s1 + $0x7f0] sm:$0xff]  }
  0xe5   : > { %3178 = vmatmul.mubr.bf16.gmra.mxu0 %v2884_v45  ;;  %v8192_v45 = vld [vmem:[%s7081_s27 + $0x2c] ss:$16 sps:$4 sm:$0xfe]  }
  0xe6   : > { %3243 = vmatmul.mubr.bf16.gmra.mxu1 %v2902_v14  ;;  %6321 = vmatpush3.bf16.msra.mxu0 %v6827_v48  ;;  %v3409_v14 = vsel %vm1294_vm1, %v3407_v4, %v3408_v44 }
  0xe7   : > { %6361 = vmatpush3.bf16.msra.mxu1 %v6828_v22  ;;  %6322 = vmatprep.subr.bf16.mxu0 %v6829_v18  ;;  %v6851_v22 = vld [vmem:[%s8930_s1 + $0x730] sm:$0xff]  }
  0xe8   : > { %6362 = vmatprep.subr.bf16.mxu1 %v6830_v15  ;;  %3672 = vmatprep.mubr.bf16.mxu0 %v3409_v14  ;;  %v6852_v18 = vld [vmem:[%s8930_s1 + $0x7b0] sm:$0xff]   ;;  %v3872_v15 = vshll.u32 %v8181_v12, 16  ;;  %v3416_v14 = vrot.slane %v8259_v60, 1 }
  0xea   : > { %6323 = vmatpush3.bf16.msra.mxu0 %v6831_v19  ;;  %v8251_v19 = vld [vmem:[%s7081_s27 + $0x64] ss:$16 sps:$4 sm:$0xff]  }
  0xeb   : > { %6363 = vmatpush3.bf16.msra.mxu1 %v6832_v1  ;;  %6388 = vmatprep.subr.bf16.mxu0 %v6845_v2  ;;  %v3895_v1 = vshrl.u32 %v8192_v45, 16  ;;  %v6860_v2 = vld [vmem:[%s8930_s1 + $0x7e8] sm:$0xff]  }
  0xed   : > { %v5844_v24 = vpop.f32.mrf.mxu0 }
  0xee   : > { %v5884_v26 = vpop.f32.mrf.mxu1 }
  0xef   : > { %v5845_v27 = vpop.f32.mrf.mxu0 }
  0xf0   : > { %v5846_v58 = vadd.f32 %v5845_v27, %v5844_v24  ;;  %v5885_v21 = vpop.f32.mrf.mxu1  ;;  %v3405_v24 = vrot.slane %v8178_v36, 1  ;;  %v3411_v27 = vrot.slane %v8189_v7, 1 }
  0xf1   : > { %v5886_v3 = vadd.f32 %v5885_v21, %v5884_v26  ;;  %v5847_v31 = vpop.f32.mrf.mxu0  ;;  %v3414_v21 = vrot.slane %v8195_v56, 1 }
  0xf2   : > { %v5887_v61 = vpop.f32.mrf.mxu1  ;;  %v3406_v43 = vsel %vm1294_vm1, %v3404_v23, %v3405_v24 }
  0xf3   : > { %v8131_v54 = vadd.f32 %v5886_v3, %v5846_v58  ;;  %v5848_v55 = vpop.f32.mrf.mxu0  ;;  %v3413_v58 = vrot.slane %v8192_v45, 1  ;;  %v6846_v3 = vld [vmem:[%s8930_s1 + $0x7f8] sm:$0xff]   ;;  %3673 = vmatmul.mubr.bf16.vlgmr.msra.gmra.mxu0 %v3406_v43 }
  0xf4   : > { %v5849_v6 = vadd.f32 %v5848_v55, %v5847_v31  ;;  %v5888_v13 = vpop.f32.mrf.mxu1  ;;  %6428 = vmatprep.subr.bf16.mxu1 %v6846_v3  ;;  %v6847_v55 = vld [vmem:[%s8930_s1 + $0x738] sm:$0xff]  }
  0xf5   : > { %v5889_v33 = vadd.f32 %v5888_v13, %v5887_v61  ;;  %v5850_v25 = vpop.f32.mrf.mxu0  ;;  %v3412_v61 = vsel %vm1294_vm1, %v3410_v34, %v3411_v27  ;;  %v3415_v10 = vsel %vm1294_vm1, %v3413_v58, %v3414_v21  ;;  %6389 = vmatpush3.bf16.msra.mxu0 %v6847_v55  ;;  %v8310_v55 = vrot.slane %v3895_v1, 1 }
  0xf6   : > { %v5890_v51 = vpop.f32.mrf.mxu1  ;;  %3737 = vmatprep.mubr.bf16.mxu1 %v3415_v10  ;;  %v8300_v10 = vld [vmem:[%s8931_s2] ss:$0 sm:$0xff] }
  0xf7   : > { %v8145_v63 = vadd.f32 %v5889_v33, %v5849_v6  ;;  %v5851_v28 = vpop.f32.mrf.mxu0  ;;  %3738 = vmatmul.mubr.bf16.vlgmr.msra.gmra.mxu1 %v3412_v61  ;;  %v8295_v61 = vrot.slane %v3872_v15, 2  ;;  %v3847_v15 = vshll.u32 %v8172_v16, 16  ;;  %v661_v1 = vadd.f32 %v8300_v10, %v8131_v54 }
  0xf8   : > { %v5891_v35 = vpop.f32.mrf.mxu1  ;;  %v5852_v40 = vadd.f32 %v5851_v28, %v5850_v25  ;;  %v6849_v25 = vld [vmem:[%s8930_s1 + $0x770] sm:$0xff]   ;;  %6429 = vmatpush3.bf16.msra.mxu1 %v6848_v53 }
  0xf9   : > { %v5892_v0 = vadd.f32 %v5891_v35, %v5890_v51  ;;  %v5853_v32 = vpop.f32.mrf.mxu0  ;;  %v3869_v51 = vshrl.u32 %v8181_v12, 16  ;;  %v8237_v35 = vrot.slane %v3861_v59, 1  ;;  %6390 = vmatprep.subr.bf16.mxu0 %v6849_v25  ;;  %6430 = vmatprep.subr.bf16.mxu1 %v6850_v20  ;;  %v8264_v59 = vld [vmem:[%s7081_s27 + $0x68] ss:$16 sps:$4 sm:$0xff]   ;;  %v3417_v12 = vsel %vm1294_vm1, %v3405_v24, %v3416_v14 }
  0xfa   : > { %v5893_v42 = vpop.f32.mrf.mxu1  ;;  %6391 = vmatpush3.bf16.msra.mxu0 %v6851_v22  ;;  %v3420_v43 = vrot.slane %v8264_v59, 1  ;;  %v3906_v20 = vshll.u32 %v8195_v56, 16 }
  0xfb   : > { %v8163_v49 = vadd.f32 %v5892_v0, %v5852_v40  ;;  %v5854_v41 = vpop.f32.mrf.mxu0  ;;  %v8242_v0 = vrot.slane %v3864_v8, 2 }
  0xfc   : > { %v5894_v29 = vpop.f32.mrf.mxu1  ;;  %v5855_v47 = vadd.f32 %v5854_v41, %v5853_v32  ;;  %6431 = vmatpush3.bf16.msra.mxu1 %v6852_v18  ;;  %v3421_v24 = vsel %vm1294_vm1, %v3411_v27, %v3420_v43  ;;  %v6864_v27 = vld [vmem:[%s8930_s1 + $0x7e0] sm:$0xff]   ;;  %v8332_v18 = vld [vmem:[%s7081_s27 + $0x90] sm:$0xff] }
  0xfd   : > { %v5895_v52 = vadd.f32 %v5894_v29, %v5893_v42  ;;  %v5856_v11 = vpop.f32.mrf.mxu0  ;;  %v8247_v42 = vrot.slane %v3869_v51, 1  ;;  %6432 = vmatprep.subr.bf16.mxu1 %v6860_v2  ;;  %v6865_v51 = vld [vmem:[%s8930_s1 + $0x720] sm:$0xff]  }
  0xfe   : > { %v5896_v37 = vpop.f32.mrf.mxu1 }
  0xff   : > { %v8175_v50 = vadd.f32 %v5895_v52, %v5855_v47  ;;  %v5857_v38 = vpop.f32.mrf.mxu0  ;;  %v3898_v47 = vshll.u32 %v8192_v45, 16  ;;  %v8256_v52 = vld [vmem:[%s7081_s27 + $0x6c] ss:$16 sps:$4 sm:$0xff]  }
 0x100   : > { %v5897_v26 = vpop.f32.mrf.mxu1  ;;  %v5858_v62 = vadd.f32 %v5857_v38, %v5856_v11  ;;  %v3903_v11 = vshrl.u32 %v8195_v56, 16  ;;  %v6859_v38 = vld [vmem:[%s8930_s1 + $0x768] sm:$0xff]   ;;  %v3422_v45 = vrot.slane %v8256_v52, 1  ;;  %v8340_v56 = vcombine.high %v7902_v39, %v8332_v18 }
 0x101   : > { %v5898_v31 = vadd.f32 %v5897_v26, %v5896_v37  ;;  %v5859_v46 = vpop.f32.mrf.mxu0  ;;  %v3418_v37 = vrot.slane %v8251_v19, 1  ;;  %6392 = vmatprep.subr.bf16.mxu0 %v6859_v38  ;;  %v6871_v38 = vld [vmem:[%s8930_s1 + $0x758] sm:$0xff]  }
 0x102   : > { %v5899_v30 = vpop.f32.mrf.mxu1  ;;  %v8322_v8 = vrot.slane %v3903_v11, 1 }
 0x103   : > { %v8223_v57 = vadd.f32 %v5898_v31, %v5858_v62  ;;  %v5860_v6 = vpop.f32.mrf.mxu0  ;;  %v3419_v58 = vsel %vm1294_vm1, %v3408_v44, %v3418_v37  ;;  %v6861_v44 = vld [vmem:[%s8930_s1 + $0x728] sm:$0xff]  }
 0x104   : > { %v5900_v13 = vpop.f32.mrf.mxu1  ;;  %v5861_v33 = vadd.f32 %v5860_v6, %v5859_v46  ;;  %3680 = vmatprep.mubr.bf16.mxu0 %v3419_v58  ;;  %v3423_v46 = vsel %vm1294_vm1, %v3414_v21, %v3422_v45  ;;  %v6862_v21 = vld [vmem:[%s8930_s1 + $0x7a8] sm:$0xff]   ;;  %6393 = vmatpush3.bf16.msra.mxu0 %v6861_v44  ;;  %v3426_v58 = vrot.slane %v8340_v56, 1 }
 0x105   : > { %v5901_v9 = vadd.f32 %v5900_v13, %v5899_v30  ;;  %v5862_v28 = vpop.f32.mrf.mxu0  ;;  %3745 = vmatprep.mubr.bf16.mxu1 %v3423_v46  ;;  %3681 = vmatmul.mubr.bf16.gmra.mxu0 %v3417_v12  ;;  %v6863_v13 = vld [vmem:[%s8930_s1 + $0x760] sm:$0xff]  }
 0x106   : > { %v5902_v40 = vpop.f32.mrf.mxu1  ;;  %3746 = vmatmul.mubr.bf16.gmra.mxu1 %v3421_v24  ;;  %6394 = vmatprep.subr.bf16.mxu0 %v6863_v13  ;;  %v3427_v13 = vsel %vm1294_vm1, %v3418_v37, %v3426_v58 }
 0x107   : > { %v8235_v48 = vadd.f32 %v5901_v9, %v5861_v33  ;;  %v5863_v32 = vpop.f32.mrf.mxu0  ;;  %v8317_v33 = vrot.slane %v3898_v47, 2  ;;  %6433 = vmatpush3.bf16.msra.mxu1 %v6862_v21  ;;  %v8343_v47 = vld [vmem:[%s7081_s27 + $0x98] sm:$0xff]  ;;  %3688 = vmatprep.mubr.bf16.mxu0 %v3427_v13 }
 0x108   : > { %v5864_v41 = vadd.f32 %v5863_v32, %v5862_v28  ;;  %v5903_v29 = vpop.f32.mrf.mxu1  ;;  %6434 = vmatprep.subr.bf16.mxu1 %v6864_v27  ;;  %v3844_v32 = vshrl.u32 %v8172_v16, 16  ;;  %6395 = vmatpush3.bf16.msra.mxu0 %v6865_v51  ;;  %v8353_v16 = vcombine.high %v7913_v5, %v8343_v47  ;;  %v8357_v54 = vcombine.low %v7913_v5, %v8343_v47  ;;  %v6873_v5 = vld [vmem:[%s8930_s1 + $0x718] sm:$0xff]  }
 0x109   : > { %v5904_v4 = vadd.f32 %v5903_v29, %v5902_v40  ;;  %v5865_v23 = vpop.f32.mrf.mxu0  ;;  %v6866_v40 = vld [vmem:[%s8930_s1 + $0x7a0] sm:$0xff]   ;;  %6396 = vmatprep.subr.bf16.mxu0 %v6871_v38  ;;  %v6874_v27 = vld [vmem:[%s8930_s1 + $0x798] sm:$0xff]   ;;  %v663_v38 = vadd.f32 %v8300_v10, %v8163_v49  ;;  %v8424_v49 = vor.u32 %v8295_v61, %v8247_v42  ;;  %v6881_v61 = vld [vmem:[%s8930_s1 + $0x708] sm:$0xff]  }
 0x10a   : > { %v5905_v26 = vpop.f32.mrf.mxu1  ;;  %v3430_v12 = vrot.slane %v8353_v16, 1  ;;  %v3428_v44 = vrot.slane %v8357_v54, 1 }
 0x10b   : > { %v8271_v34 = vadd.f32 %v5904_v4, %v5864_v41  ;;  %v5866_v62 = vpop.f32.mrf.mxu0  ;;  %v8347_v4 = vcombine.low %v7902_v39, %v8332_v18  ;;  %6435 = vmatpush3.bf16.msra.mxu1 %v6866_v40  ;;  %v3855_v40 = vshll.u32 %v8178_v36, 16 }
 0x10c   : > { %v5867_v3 = vadd.f32 %v5866_v62, %v5865_v23  ;;  %v5906_v31 = vpop.f32.mrf.mxu1  ;;  %v8349_v23 = vrot.slane %v3906_v20, 2  ;;  %v3429_v37 = vsel %vm1294_vm1, %v3420_v43, %v3428_v44  ;;  %6397 = vmatpush3.bf16.msra.mxu0 %v6873_v5  ;;  %v3852_v20 = vshrl.u32 %v8178_v36, 16  ;;  %v6877_v43 = vld [vmem:[%s8930_s1 + $0x710] sm:$0xff]  }
 0x10d   : > { %v5907_v30 = vadd.f32 %v5906_v31, %v5905_v26  ;;  %v5924_v6 = vpop.f32.mrf.mxu0  ;;  %v8362_v26 = vrot.slane %v3844_v32, 1  ;;  %v3424_v2 = vrot.slane %v8347_v4, 1  ;;  %v6878_v36 = vld [vmem:[%s8930_s1 + $0x790] sm:$0xff]   ;;  %v3867_v5 = vor.u32 %v8242_v0, %v8237_v35 }
 0x10e   : > { %v5964_v9 = vpop.f32.mrf.mxu1  ;;  %v3881_v35 = vshll.u32 %v8186_v17, 16 }
 0x10f   : > { %v8315_v53 = vadd.f32 %v5907_v30, %v5867_v3  ;;  %v5925_v25 = vpop.f32.mrf.mxu0  ;;  %v6872_v3 = vld [vmem:[%s8930_s1 + $0x7d8] sm:$0xff]  }
 0x110   : > { %v5926_v28 = vadd.f32 %v5925_v25, %v5924_v6  ;;  %v5965_v22 = vpop.f32.mrf.mxu1  ;;  %v662_v6 = vadd.f32 %v8300_v10, %v8145_v63  ;;  %6436 = vmatprep.subr.bf16.mxu1 %v6872_v3  ;;  %v8389_v25 = vrot.slane %v3847_v15, 2  ;;  %v3431_v63 = vsel %vm1294_vm1, %v3422_v45, %v3430_v12  ;;  %v6876_v45 = vld [vmem:[%s8930_s1 + $0x7d0] sm:$0xff]   ;;  %v6879_v3 = vld [vmem:[%s8930_s1 + $0x748] sm:$0xff]  }
 0x111   : > { %v5966_v41 = vadd.f32 %v5965_v22, %v5964_v9  ;;  %v5927_v29 = vpop.f32.mrf.mxu0  ;;  %v3425_v9 = vsel %vm1294_vm1, %v3416_v14, %v3424_v2  ;;  %v6875_v14 = vld [vmem:[%s8930_s1 + $0x750] sm:$0xff]   ;;  %3753 = vmatprep.mubr.bf16.mxu1 %v3431_v63  ;;  %6437 = vmatpush3.bf16.msra.mxu1 %v6874_v27  ;;  %v3886_v63 = vshrl.u32 %v8189_v7, 16 }
 0x112   : > { %v5967_v11 = vpop.f32.mrf.mxu1  ;;  %3689 = vmatmul.mubr.bf16.gmra.mxu0 %v3425_v9  ;;  %3754 = vmatmul.mubr.bf16.gmra.mxu1 %v3429_v37 }
 0x113   : > { %v1167_v39 = vadd.f32 %v5966_v41, %v5926_v28  ;;  %v5928_v62 = vpop.f32.mrf.mxu0  ;;  %6398 = vmatprep.subr.bf16.mxu0 %v6875_v14  ;;  %v3854_v41 = vrot.slane %v3852_v20, 1  ;;  %3696 = vmatprep.mubr.bf16.mxu0 %v3426_v58  ;;  %v6880_v58 = vld [vmem:[%s8930_s1 + $0x7c8] sm:$0xff]  }
 0x114   : > { %v5929_v31 = vadd.f32 %v5928_v62, %v5927_v29  ;;  %v5968_v46 = vpop.f32.mrf.mxu1  ;;  %6438 = vmatprep.subr.bf16.mxu1 %v6876_v45  ;;  %6399 = vmatpush3.bf16.msra.mxu0 %v6877_v43 }
 0x115   : > { %v8374_v30 = vadd.f32 %v1167_v39, %v661_v1  ;;  %v5969_v24 = vadd.f32 %v5968_v46, %v5967_v11  ;;  %v5930_v21 = vpop.f32.mrf.mxu0  ;;  %v3857_v39 = vrot.slane %v3855_v40, 2  ;;  %3761 = vmatprep.mubr.bf16.mxu1 %v3430_v12  ;;  %6400 = vmatprep.subr.bf16.mxu0 %v6879_v3 }
 0x116   : > { %v5970_v51 = vpop.f32.mrf.mxu1  ;;  %6439 = vmatpush3.bf16.msra.mxu1 %v6878_v36  ;;  %v3921_v36 = vshrl.u32 %v8251_v19, 16 }
 0x117   : > { %v1170_v28 = vadd.f32 %v5969_v24, %v5929_v31  ;;  %v5931_v22 = vpop.f32.mrf.mxu0  ;;  %v3878_v31 = vshrl.u32 %v8186_v17, 16  ;;  %v664_v17 = vadd.f32 %v8300_v10, %v8175_v50  ;;  %6440 = vmatprep.subr.bf16.mxu1 %v6880_v58  ;;  %v6884_v50 = vld [vmem:[%s8930_s1 + $0x7c0] sm:$0xff]   ;;  %v6889_v58 = vld [vmem:[%s8930_s1 + $0x838] sm:$0xff]  }
 0x118   : > { %v5932_v32 = vadd.f32 %v5931_v22, %v5930_v21  ;;  %v5971_v15 = vpop.f32.mrf.mxu1  ;;  %v3901_v21 = vor.u32 %v8317_v33, %v8310_v55  ;;  %v6882_v55 = vld [vmem:[%s8930_s1 + $0x788] sm:$0xff]   ;;  %v3883_v33 = vrot.slane %v3881_v35, 2  ;;  %6401 = vmatpush3.bf16.msra.mxu0 %v6881_v61  ;;  %v3889_v22 = vshll.u32 %v8189_v7, 16  ;;  %v6886_v7 = vld [vmem:[%s8930_s1 + $0x780] sm:$0xff]  }
 0x119   : > { %v8410_v29 = vadd.f32 %v1170_v28, %v662_v6  ;;  %v5972_v1 = vadd.f32 %v5971_v15, %v5970_v51  ;;  %v5933_v11 = vpop.f32.mrf.mxu0  ;;  %v8434_v6 = vor.u32 %v8349_v23, %v8322_v8  ;;  %v3880_v12 = vrot.slane %v3878_v31, 1  ;;  %v6883_v23 = vld [vmem:[%s8930_s1 + $0x740] sm:$0xff]  }
 0x11a   : > { %v5973_v62 = vpop.f32.mrf.mxu1  ;;  %v3876_v51 = vsel %vm2812_vm2, %v3867_v5, %v8424_v49  ;;  %3697 = vmatmul.mubr.bf16.gmra.mxu0 %v3424_v2  ;;  %v3850_v28 = vor.u32 %v8389_v25, %v8362_v26  ;;  %3762 = vmatmul.mubr.bf16.gmra.mxu1 %v3428_v44  ;;  %v6885_v2 = vld [vmem:[%s8930_s1 + $0x700] sm:$0xff]   ;;  %v3888_v15 = vrot.slane %v3886_v63, 1  ;;  %v3891_v44 = vrot.slane %v3889_v22, 2  ;;  %v6888_v5 = vld [vmem:[%s8930_s1 + $0x8f8] sm:$0xff]  }
 0x11b   : > { %v1175_v46 = vadd.f32 %v5972_v1, %v5932_v32  ;;  %v5934_v24 = vpop.f32.mrf.mxu0  ;;  %v3910_v20 = vsel %vm2812_vm2, %v3901_v21, %v8434_v6  ;;  %6402 = vmatprep.subr.bf16.mxu0 %v6883_v23  ;;  %v8468_v32 = vor.u32 %v3857_v39, %v3854_v41  ;;  %6441 = vmatpush3.bf16.msra.mxu1 %v6882_v55  ;;  %v6887_v41 = vld [vmem:[%s8930_s1 + $0x878] sm:$0xff]   ;;  %v3924_v31 = vshll.u32 %v8251_v19, 16  ;;  %v6891_v55 = vld [vmem:[%s8930_s1 + $0x870] sm:$0xff]  }
 0x11c   : > { %v5935_v0 = vadd.f32 %v5934_v24, %v5933_v11  ;;  %v5974_v42 = vpop.f32.mrf.mxu1  ;;  %4223 = vmatprep.mubr.bf16.mxu0 %v3876_v51  ;;  %v3884_v26 = vor.u32 %v3883_v33, %v3880_v12  ;;  %6442 = vmatprep.subr.bf16.mxu1 %v6884_v50  ;;  %v8481_v3 = vor.u32 %v3891_v44, %v3888_v15  ;;  %v3923_v21 = vrot.slane %v3921_v36, 1  ;;  %v6890_v19 = vld [vmem:[%s8930_s1 + $0x8b8] sm:$0xff]   ;;  %v6892_v23 = vld [vmem:[%s8930_s1 + $0x8f0] sm:$0xff]  }
 0x11d   : > { %v8440_v13 = vadd.f32 %v1175_v46, %v663_v38  ;;  %v5975_v9 = vadd.f32 %v5974_v42, %v5973_v62  ;;  %v5936_v27 = vpop.f32.mrf.mxu0  ;;  %v665_v38 = vadd.f32 %v8300_v10, %v8223_v57  ;;  %6403 = vmatpush3.bf16.msra.mxu0 %v6885_v2  ;;  %4288 = vmatprep.mubr.bf16.mxu1 %v3910_v20  ;;  %v3926_v12 = vrot.slane %v3924_v31, 2 }
 0x11e   : > { %v5976_v8 = vpop.f32.mrf.mxu1  ;;  %v3859_v24 = vsel %vm2812_vm2, %v3850_v28, %v8468_v32  ;;  %6468 = vmatprep.subr.bf16.mxu0 %v6887_v41  ;;  %v3893_v61 = vsel %vm2812_vm2, %v3884_v26, %v8481_v3  ;;  %v3939_v33 = vshrl.u32 %v8256_v52, 16  ;;  %v3942_v63 = vshll.u32 %v8256_v52, 16 }
 0x11f   : > { %v1178_v37 = vadd.f32 %v5975_v9, %v5935_v0  ;;  %v5937_v14 = vpop.f32.mrf.mxu0  ;;  %6443 = vmatpush3.bf16.msra.mxu1 %v6886_v7  ;;  %v8508_v51 = vor.u32 %v3926_v12, %v3923_v21  ;;  %v3912_v2 = vshrl.u32 %v8259_v60, 16  ;;  %v3915_v15 = vshll.u32 %v8259_v60, 16  ;;  %v6895_v60 = vld [vmem:[%s8930_s1 + $0x868] sm:$0xff]   ;;  %v6899_v12 = vld [vmem:[%s8930_s1 + $0x860] sm:$0xff]  }
 0x120   : > { %v5938_v45 = vadd.f32 %v5937_v14, %v5936_v27  ;;  %v5977_v40 = vpop.f32.mrf.mxu1  ;;  %v666_v27 = vadd.f32 %v8300_v10, %v8235_v48  ;;  %6508 = vmatprep.subr.bf16.mxu1 %v6888_v5  ;;  %v6893_v14 = vld [vmem:[%s8930_s1 + $0x830] sm:$0xff]   ;;  %v3941_v50 = vrot.slane %v3939_v33, 1  ;;  %v3930_v7 = vshrl.u32 %v8264_v59, 16 }
 0x121   : > { %v8470_v43 = vadd.f32 %v1178_v37, %v664_v17  ;;  %v5978_v1 = vadd.f32 %v5977_v40, %v5976_v8  ;;  %v5939_v11 = vpop.f32.mrf.mxu0  ;;  %v3928_v52 = vsel %vm2812_vm2, %v8424_v49, %v8508_v51  ;;  %v3944_v40 = vrot.slane %v3942_v63, 2 }
 0x122   : > { %v5979_v25 = vpop.f32.mrf.mxu1  ;;  %4224 = vmatmul.mubr.bf16.vlgmr.msra.gmra.mxu0 %v3859_v24  ;;  %4289 = vmatmul.mubr.bf16.vlgmr.msra.gmra.mxu1 %v3893_v61  ;;  %v3933_v26 = vshll.u32 %v8264_v59, 16  ;;  %v3914_v49 = vrot.slane %v3912_v2, 1  ;;  %v3917_v41 = vrot.slane %v3915_v15, 2  ;;  %v6897_v24 = vld [vmem:[%s8930_s1 + $0x828] sm:$0xff]   ;;  %v668_v21 = vadd.f32 %v8300_v10, %v8315_v53 }
 0x123   : > { %v1183_v39 = vadd.f32 %v5978_v1, %v5938_v45  ;;  %v5940_v62 = vpop.f32.mrf.mxu0  ;;  %6469 = vmatpush3.bf16.msra.mxu0 %v6889_v58  ;;  %6509 = vmatpush3.bf16.msra.mxu1 %v6890_v19  ;;  %v6894_v45 = vld [vmem:[%s8930_s1 + $0x8b0] sm:$0xff]   ;;  %v3957_v58 = vshrl.u32 %v8340_v56, 16 }
 0x124   : > { %v5941_v57 = vadd.f32 %v5940_v62, %v5939_v11  ;;  %v5980_v46 = vpop.f32.mrf.mxu1  ;;  %6470 = vmatprep.subr.bf16.mxu0 %v6891_v55  ;;  %v667_v11 = vadd.f32 %v8300_v10, %v8271_v34  ;;  %6510 = vmatprep.subr.bf16.mxu1 %v6892_v23  ;;  %v6896_v34 = vld [vmem:[%s8930_s1 + $0x8e8] sm:$0xff]   ;;  %v3932_v62 = vrot.slane %v3930_v7, 1  ;;  %v3935_v5 = vrot.slane %v3933_v26, 2 }
 0x125   : > { %v8492_v35 = vadd.f32 %v1183_v39, %v665_v38  ;;  %v5981_v0 = vadd.f32 %v5980_v46, %v5979_v25  ;;  %v5942_v42 = vpop.f32.mrf.mxu0  ;;  %4231 = vmatprep.mubr.bf16.mxu0 %v3928_v52  ;;  %v8528_v38 = vor.u32 %v3944_v40, %v3941_v50  ;;  %v8541_v46 = vor.u32 %v3917_v41, %v3914_v49 }
 0x126   : > { %v5982_v9 = vpop.f32.mrf.mxu1  ;;  %v3959_v10 = vrot.slane %v3957_v58, 1  ;;  %v6907_v58 = vld [vmem:[%s8930_s1 + $0x850] sm:$0xff]  }
 0x127   : > { %v1186_v8 = vadd.f32 %v5981_v0, %v5941_v57  ;;  %v5943_v17 = vpop.f32.mrf.mxu0  ;;  %6471 = vmatpush3.bf16.msra.mxu0 %v6893_v14  ;;  %6511 = vmatpush3.bf16.msra.mxu1 %v6894_v45  ;;  %v3946_v57 = vsel %vm2812_vm2, %v8434_v6, %v8528_v38  ;;  %v8549_v0 = vor.u32 %v3935_v5, %v3932_v62  ;;  %v6898_v6 = vld [vmem:[%s8930_s1 + $0x8a8] sm:$0xff]   ;;  %v3951_v14 = vshll.u32 %v8347_v4, 16  ;;  %v6903_v45 = vld [vmem:[%s8930_s1 + $0x858] sm:$0xff]  }
 0x128   : > { %v5944_v37 = vadd.f32 %v5943_v17, %v5942_v42  ;;  %v5983_v48 = vpop.f32.mrf.mxu1  ;;  %6472 = vmatprep.subr.bf16.mxu0 %v6895_v60  ;;  %4296 = vmatprep.mubr.bf16.mxu1 %v3946_v57  ;;  %v3960_v42 = vshll.u32 %v8340_v56, 16  ;;  %v3919_v19 = vsel %vm2812_vm2, %v8468_v32, %v8541_v46  ;;  %v6900_v56 = vld [vmem:[%s8930_s1 + $0x8e0] sm:$0xff]  }
 0x129   : > { %v8514_v20 = vadd.f32 %v1186_v8, %v666_v27  ;;  %v5984_v28 = vadd.f32 %v5983_v48, %v5982_v9  ;;  %v5945_v22 = vpop.f32.mrf.mxu0  ;;  %6512 = vmatprep.subr.bf16.mxu1 %v6896_v34  ;;  %v3937_v27 = vsel %vm2812_vm2, %v8481_v3, %v8549_v0  ;;  %v6901_v32 = vld [vmem:[%s8930_s1 + $0x820] sm:$0xff]   ;;  %v3975_v8 = vshrl.u32 %v8353_v16, 16 }
 0x12a   : > { %v5985_v1 = vpop.f32.mrf.mxu1  ;;  %4232 = vmatmul.mubr.bf16.gmra.mxu0 %v3919_v19  ;;  %v3962_v55 = vrot.slane %v3960_v42, 2  ;;  %4297 = vmatmul.mubr.bf16.gmra.mxu1 %v3937_v27  ;;  %v6902_v3 = vld [vmem:[%s8930_s1 + $0x8a0] sm:$0xff]   ;;  %v3948_v48 = vshrl.u32 %v8347_v4, 16  ;;  %v6904_v4 = vld [vmem:[%s8930_s1 + $0x8d8] sm:$0xff]   ;;  %v6911_v27 = vld [vmem:[%s8930_s1 + $0x848] sm:$0xff]  }
 0x12b   : > { %v1191_v44 = vadd.f32 %v5984_v28, %v5944_v37  ;;  %v5946_v25 = vpop.f32.mrf.mxu0  ;;  %6473 = vmatpush3.bf16.msra.mxu0 %v6897_v24  ;;  %6513 = vmatpush3.bf16.msra.mxu1 %v6898_v6  ;;  %v3978_v37 = vshll.u32 %v8353_v16, 16  ;;  %v3977_v50 = vrot.slane %v3975_v8, 1  ;;  %v3966_v28 = vshrl.u32 %v8357_v54, 16  ;;  %v6908_v6 = vld [vmem:[%s8930_s1 + $0x8d0] sm:$0xff]  }
 0x12c   : > { %v5947_v36 = vadd.f32 %v5946_v25, %v5945_v22  ;;  %v5986_v39 = vpop.f32.mrf.mxu1  ;;  %6474 = vmatprep.subr.bf16.mxu0 %v6899_v12  ;;  %v3963_v63 = vor.u32 %v3962_v55, %v3959_v10  ;;  %6514 = vmatprep.subr.bf16.mxu1 %v6900_v56  ;;  %v3969_v22 = vshll.u32 %v8357_v54, 16  ;;  %v6912_v55 = vld [vmem:[%s8930_s1 + $0x8c8] sm:$0xff]  }
 0x12d   : > { %v8536_v59 = vadd.f32 %v1191_v44, %v667_v11  ;;  %v5987_v31 = vadd.f32 %v5986_v39, %v5985_v1  ;;  %v6004_v53 = vpop.f32.mrf.mxu0  ;;  %v3980_v15 = vrot.slane %v3978_v37, 2  ;;  %v3950_v1 = vrot.slane %v3948_v48, 1  ;;  %v6915_v37 = vld [vmem:[%s8930_s1 + $0x840] sm:$0xff]  }
 0x12e   : > { %v6044_v9 = vpop.f32.mrf.mxu1  ;;  %v3964_v16 = vsel %vm2812_vm2, %v8508_v51, %v3963_v63  ;;  %v3953_v11 = vrot.slane %v3951_v14, 2  ;;  %v3968_v54 = vrot.slane %v3966_v28, 1  ;;  %v3971_v7 = vrot.slane %v3969_v22, 2  ;;  %v6905_v51 = vld [vmem:[%s8930_s1 + $0x818] sm:$0xff]   ;;  %v6917_v28 = vld [vmem:[%s8930_s1 + $0x800] sm:$0xff]  }
 0x12f   : > { %v1194_v61 = vadd.f32 %v5987_v31, %v5947_v36  ;;  %v6005_v17 = vpop.f32.mrf.mxu0  ;;  %6475 = vmatpush3.bf16.msra.mxu0 %v6901_v32  ;;  %4239 = vmatprep.mubr.bf16.mxu0 %v3964_v16  ;;  %v3981_v49 = vor.u32 %v3980_v15, %v3977_v50  ;;  %v6906_v36 = vld [vmem:[%s8930_s1 + $0x898] sm:$0xff]  }
 0x130   : > { %v6045_v23 = vpop.f32.mrf.mxu1  ;;  %v6006_v52 = vadd.f32 %v6005_v17, %v6004_v53  ;;  %6515 = vmatpush3.bf16.msra.mxu1 %v6902_v3  ;;  %v3954_v41 = vor.u32 %v3953_v11, %v3950_v1  ;;  %6476 = vmatprep.subr.bf16.mxu0 %v6903_v45  ;;  %v3972_v34 = vor.u32 %v3971_v7, %v3968_v54  ;;  %v6919_v1 = vld [vmem:[%s7081_s27 + $0x20] ss:$16 sps:$4 sm:$0xfc]   ;;  %v6924_v54 = vld [vmem:[%s7081_s27 + $0x44] ss:$16 sps:$4 sm:$0xff]  }
 0x131   : > { %v8567_v33 = vadd.f32 %v1194_v61, %v668_v21  ;;  %v6007_v40 = vpop.f32.mrf.mxu0  ;;  %v6046_v26 = vadd.f32 %v6045_v23, %v6044_v9  ;;  %6516 = vmatprep.subr.bf16.mxu1 %v6904_v4  ;;  %v3982_v57 = vsel %vm2812_vm2, %v8528_v38, %v3981_v49  ;;  %v8651_v11 = vld [vmem:[%s7081_s27 + $0x40] ss:$16 sps:$4 sm:$0xff]   ;;  %v6921_v4 = vld [vmem:[%s7081_s27 + $0x24] ss:$16 sps:$4 sm:$0xfc]  }
 0x132   : > { %v6047_v2 = vpop.f32.mrf.mxu1  ;;  %v3955_v24 = vsel %vm2812_vm2, %v8541_v46, %v3954_v41  ;;  %4304 = vmatprep.mubr.bf16.mxu1 %v3982_v57  ;;  %v3973_v21 = vsel %vm2812_vm2, %v8549_v0, %v3972_v34  ;;  %v6909_v46 = vld [vmem:[%s8930_s1 + $0x810] sm:$0xff]  }
 0x133   : > { %v6008_v44 = vpop.f32.mrf.mxu0  ;;  %v1631_v39 = vadd.f32 %v6046_v26, %v6006_v52  ;;  %4240 = vmatmul.mubr.bf16.gmra.mxu0 %v3955_v24  ;;  %4305 = vmatmul.mubr.bf16.gmra.mxu1 %v3973_v21  ;;  %v6910_v0 = vld [vmem:[%s8930_s1 + $0x890] sm:$0xff]   ;;  %v6918_v52 = vld [vmem:[%s8930_s1 + $0x880] sm:$0xff]   ;;  %v6930_v21 = vld [vmem:[%s7081_s27 + $0x4c] ss:$16 sps:$4 sm:$0xff]  }
 0x134   : > { %v6048_v25 = vpop.f32.mrf.mxu1  ;;  %v6009_v60 = vadd.f32 %v6008_v44, %v6007_v40  ;;  %6477 = vmatpush3.bf16.msra.mxu0 %v6905_v51  ;;  %6517 = vmatpush3.bf16.msra.mxu1 %v6906_v36  ;;  %v4487_v44 = vrot.slane %v6919_v1, 2  ;;  %v4490_v51 = vrot.slane %v6921_v4, 2 }
 0x135   : > { %v6049_v62 = vadd.f32 %v6048_v25, %v6047_v2  ;;  %v6010_v5 = vpop.f32.mrf.mxu0  ;;  %v8608_v42 = vadd.f32 %v1631_v39, %v8374_v30  ;;  %6478 = vmatprep.subr.bf16.mxu0 %v6907_v58  ;;  %6518 = vmatprep.subr.bf16.mxu1 %v6908_v6  ;;  %v4488_v25 = vrot.slane %v8651_v11, 2 }
 0x136   : > { %v6050_v31 = vpop.f32.mrf.mxu1  ;;  %4247 = vmatprep.mubr.bf16.mxu0 %v3963_v63  ;;  %4312 = vmatprep.mubr.bf16.mxu1 %v3981_v49  ;;  %v6914_v63 = vld [vmem:[%s8930_s1 + $0x888] sm:$0xff]  }
 0x137   : > { %v1634_v38 = vadd.f32 %v6049_v62, %v6009_v60  ;;  %v6011_v61 = vpop.f32.mrf.mxu0  ;;  %v4491_v60 = vrot.slane %v6924_v54, 2  ;;  %v4489_v57 = vsel %vm4486_vm3, %v4487_v44, %v4488_v25  ;;  %v4346_v54 = vld [vmem:[%s7081_s27 + $0xa8] sm:$0x11] }
 0x138   : > { %v6051_v19 = vpop.f32.mrf.mxu1  ;;  %v6012_v12 = vadd.f32 %v6011_v61, %v6010_v5  ;;  %6479 = vmatpush3.bf16.msra.mxu0 %v6909_v46  ;;  %6519 = vmatpush3.bf16.msra.mxu1 %v6910_v0  ;;  %v6927_v5 = vld [vmem:[%s7081_s27 + $0x2c] ss:$16 sps:$4 sm:$0xfc]  }
 0x139   : > { %v6052_v10 = vadd.f32 %v6051_v19, %v6050_v31  ;;  %v8617_v30 = vadd.f32 %v1634_v38, %v8410_v29  ;;  %v6013_v53 = vpop.f32.mrf.mxu0  ;;  %v6913_v29 = vld [vmem:[%s8930_s1 + $0x808] sm:$0xff]   ;;  %6480 = vmatprep.subr.bf16.mxu0 %v6911_v27  ;;  %6520 = vmatprep.subr.bf16.mxu1 %v6912_v55  ;;  %v4492_v58 = vsel %vm4486_vm3, %v4490_v51, %v4491_v60  ;;  %v6931_v38 = vld [vmem:[%s7081_s27 + $0x64] ss:$16 sps:$4 sm:$0xff]   ;;  %v4496_v46 = vrot.slane %v6927_v5, 2 }
 0x13a   : > { %v6053_v9 = vpop.f32.mrf.mxu1  ;;  %v6928_v31 = vld [vmem:[%s7081_s27 + $0x48] ss:$16 sps:$4 sm:$0xff]   ;;  %v4501_v27 = vrot.slane %v6931_v38, 2 }
 0x13b   : > { %v1639_v56 = vadd.f32 %v6052_v10, %v6012_v12  ;;  %v6014_v32 = vpop.f32.mrf.mxu0  ;;  %4248 = vmatmul.mubr.bf16.gmra.mxu0 %v3954_v41  ;;  %4313 = vmatmul.mubr.bf16.gmra.mxu1 %v3972_v34  ;;  %v6925_v34 = vld [vmem:[%s7081_s27 + $0x28] ss:$16 sps:$4 sm:$0xfc]   ;;  %v6933_v12 = vld [vmem:[%s7081_s27 + $0x6c] ss:$16 sps:$4 sm:$0xff]   ;;  %v4341_v10 = vld [vmem:[%s7081_s27 + $0x80] sm:$0xff] }
 0x13c   : > { %v6054_v8 = vpop.f32.mrf.mxu1  ;;  %v6015_v23 = vadd.f32 %v6014_v32, %v6013_v53  ;;  %6481 = vmatpush3.bf16.msra.mxu0 %v6913_v29  ;;  %6521 = vmatpush3.bf16.msra.mxu1 %v6914_v63  ;;  %v4493_v6 = vrot.slane %v6925_v34, 2  ;;  %v5786_v55 = vcombine.high %v4341_v10, %v8332_v18  ;;  %v4505_v29 = vrot.slane %v6933_v12, 2 }
 0x13d   : > { %v8629_v17 = vadd.f32 %v1639_v56, %v8440_v13  ;;  %v6055_v3 = vadd.f32 %v6054_v8, %v6053_v9  ;;  %v6016_v14 = vpop.f32.mrf.mxu0  ;;  %v6916_v13 = vld [vmem:[%s8930_s1 + $0x8c0] sm:$0xff]   ;;  %6482 = vmatprep.subr.bf16.mxu0 %v6915_v37  ;;  %4763 = vmatprep.mubr.bf16.mxu0 %v4492_v58  ;;  %v4497_v9 = vrot.slane %v6930_v21, 2  ;;  %v5792_v34 = vcombine.high %v4346_v54, %v4346_v54 }
 0x13e   : > { %v6056_v50 = vpop.f32.mrf.mxu1  ;;  %6522 = vmatprep.subr.bf16.mxu1 %v6916_v13  ;;  %v6935_v56 = vld [vmem:[%s7081_s27 + $0x60] ss:$16 sps:$4 sm:$0xff]  }
 0x13f   : > { %v1642_v48 = vadd.f32 %v6055_v3, %v6015_v23  ;;  %v6017_v45 = vpop.f32.mrf.mxu0  ;;  %v6936_v23 = vld [vmem:[%s7081_s27 + $0x68] ss:$16 sps:$4 sm:$0xff]   ;;  %v4499_v13 = vrot.slane %v6935_v56, 2 }
 0x140   : > { %v6018_v40 = vadd.f32 %v6017_v45, %v6016_v14  ;;  %v6057_v2 = vpop.f32.mrf.mxu1  ;;  %6483 = vmatpush3.bf16.msra.mxu0 %v6917_v28  ;;  %6523 = vmatpush3.bf16.msra.mxu1 %v6918_v52  ;;  %v4342_v3 = vld [vmem:[%s7081_s27 + $0x88] sm:$0xff]  ;;  %v4502_v14 = vsel %vm4486_vm3, %v4491_v60, %v4501_v27  ;;  %v4506_v28 = vsel %vm4486_vm3, %v4497_v9, %v4505_v29  ;;  %v4509_v45 = vrot.slane %v5786_v55, 2 }
 0x141   : > { %v8644_v22 = vadd.f32 %v1642_v48, %v8470_v43  ;;  %v6058_v16 = vadd.f32 %v6057_v2, %v6056_v50  ;;  %v6019_v15 = vpop.f32.mrf.mxu0  ;;  %v4498_v48 = vsel %vm4486_vm3, %v4496_v46, %v4497_v9  ;;  %v5788_v52 = vcombine.high %v4342_v3, %v8343_v47 }
 0x142   : > { %v6059_v43 = vpop.f32.mrf.mxu1  ;;  %4828 = vmatprep.mubr.bf16.mxu1 %v4498_v48  ;;  %v4510_v1 = vsel %vm4486_vm3, %v4501_v27, %v4509_v45 }
 0x143   : > { %v1647_v7 = vadd.f32 %v6058_v16, %v6018_v40  ;;  %v6020_v26 = vpop.f32.mrf.mxu0  ;;  %4764 = vmatmul.mubr.bf16.vlgmr.msra.gmra.mxu0 %v4489_v57  ;;  %v4345_v40 = vld [vmem:[%s7081_s27 + $0xa0] sm:$0x11]  ;;  %v4500_v16 = vsel %vm4486_vm3, %v4488_v25, %v4499_v13  ;;  %v4513_v11 = vrot.slane %v5788_v52, 2  ;;  %s5827_s27 = sshll.u32 %s8976_s13, 6 }
 0x144   : > { %v6021_v49 = vadd.f32 %v6020_v26, %v6019_v15  ;;  %v6060_v41 = vpop.f32.mrf.mxu1  ;;  %4771 = vmatprep.mubr.bf16.mxu0 %v4502_v14  ;;  %v4503_v15 = vrot.slane %v6936_v23, 2  ;;  %v5789_v58 = vcombine.low %v4345_v40, %v4345_v40  ;;  %s8877_s13 = scalar_lea.vmem %s8932_s3, %s5827_s27 }
 0x145   : > { %v8658_v36 = vadd.f32 %v1647_v7, %v8492_v35  ;;  %v6061_v39 = vadd.f32 %v6060_v41, %v6059_v43  ;;  %v6022_v62 = vpop.f32.mrf.mxu0  ;;  %v4494_v35 = vrot.slane %v6928_v31, 2  ;;  %v5790_v43 = vcombine.high %v4345_v40, %v4345_v40 }
 0x146   : > { %v6062_v24 = vpop.f32.mrf.mxu1  ;;  %v4514_v51 = vsel %vm4486_vm3, %v4505_v29, %v4513_v11 }
 0x147   : > { %v1650_v61 = vadd.f32 %v6061_v39, %v6021_v49  ;;  %v6023_v19 = vpop.f32.mrf.mxu0  ;;  %v4495_v8 = vsel %vm4486_vm3, %v4493_v6, %v4494_v35  ;;  %v4504_v49 = vsel %vm4486_vm3, %v4494_v35, %v4503_v15  ;;  %v4517_v60 = vrot.slane %v5790_v43, 2 }
 0x148   : > { %v6024_v0 = vadd.f32 %v6023_v19, %v6022_v62  ;;  %v6063_v53 = vpop.f32.mrf.mxu1  ;;  %4829 = vmatmul.mubr.bf16.vlgmr.msra.gmra.mxu1 %v4495_v8  ;;  %v4521_v6 = vrot.slane %v5792_v34, 2  ;;  %v5791_v35 = vcombine.low %v4346_v54, %v4346_v54 }
 0x149   : > { %v6025_v32 = vpop.f32.mrf.mxu0  ;;  %v8674_v63 = vadd.f32 %v1650_v61, %v8514_v20  ;;  %v6064_v37 = vadd.f32 %v6063_v53, %v6062_v24  ;;  %v5785_v20 = vcombine.low %v4341_v10, %v8332_v18  ;;  %4836 = vmatprep.mubr.bf16.mxu1 %v4506_v28  ;;  %v5787_v18 = vcombine.low %v4342_v3, %v8343_v47 }
 0x14a   : > { %v6065_v50 = vpop.f32.mrf.mxu1  ;;  %v4518_v21 = vsel %vm4486_vm3, %v4509_v45, %v4517_v60  ;;  %v4519_v29 = vrot.slane %v5791_v35, 2 }
 0x14b   : > { %v6026_v2 = vpop.f32.mrf.mxu0  ;;  %v1655_v7 = vadd.f32 %v6064_v37, %v6024_v0  ;;  %4772 = vmatmul.mubr.bf16.gmra.mxu0 %v4500_v16  ;;  %v4507_v44 = vrot.slane %v5785_v20, 2  ;;  %v4511_v24 = vrot.slane %v5787_v18, 2  ;;  %v4515_v0 = vrot.slane %v5789_v58, 2 }
 0x14c   : > { %v6066_v4 = vpop.f32.mrf.mxu1  ;;  %v6027_v26 = vadd.f32 %v6026_v2, %v6025_v32  ;;  %4779 = vmatprep.mubr.bf16.mxu0 %v4510_v1 }
 0x14d   : > { %v8688_v41 = vadd.f32 %v1655_v7, %v8536_v59  ;;  %v6067_v25 = vadd.f32 %v6066_v4, %v6065_v50  ;;  %v6084_v39 = vpop.f32.mrf.mxu0  ;;  %v4508_v5 = vsel %vm4486_vm3, %v4499_v13, %v4507_v44  ;;  %v4512_v10 = vsel %vm4486_vm3, %v4503_v15, %v4511_v24 }
 0x14e   : > { %v6124_v31 = vpop.f32.mrf.mxu1  ;;  %v4516_v8 = vsel %vm4486_vm3, %v4507_v44, %v4515_v0 }
 0x14f   : > { %v1658_v62 = vadd.f32 %v6067_v25, %v6027_v26  ;;  %v6085_v57 = vpop.f32.mrf.mxu0 }
 0x150   : > { %4837 = vmatmul.mubr.bf16.gmra.mxu1 %v4504_v49  ;;  %v6086_v59 = vadd.f32 %v6085_v57, %v6084_v39  ;;  %v6125_v38 = vpop.f32.mrf.mxu1 }
 0x151   : > { %4844 = vmatprep.mubr.bf16.mxu1 %v4514_v51  ;;  %v8693_v47 = vadd.f32 %v1658_v62, %v8567_v33  ;;  %v6087_v61 = vpop.f32.mrf.mxu0  ;;  %v6126_v19 = vadd.f32 %v6125_v38, %v6124_v31  ;;  %v4522_v33 = vsel %vm4486_vm3, %v4513_v11, %v4521_v6 }
 0x152   : > { %v6127_v46 = vpop.f32.mrf.mxu1 }
 0x153   : > { %4780 = vmatmul.mubr.bf16.gmra.mxu0 %v4508_v5  ;;  %v6088_v12 = vpop.f32.mrf.mxu0  ;;  %v2246_v53 = vadd.f32 %v6126_v19, %v6086_v59 }
 0x154   : > { %4787 = vmatprep.mubr.bf16.mxu0 %v4518_v21  ;;  %v6089_v9 = vadd.f32 %v6088_v12, %v6087_v61  ;;  %v6128_v27 = vpop.f32.mrf.mxu1 }
 0x155   : > { %v8699_v56 = vadd.f32 %v2246_v53, %v8608_v42  ;;  %v6129_v55 = vadd.f32 %v6128_v27, %v6127_v46  ;;  %v6090_v32 = vpop.f32.mrf.mxu0  ;;  %v4520_v42 = vsel %vm4486_vm3, %v4511_v24, %v4519_v29 }
 0x156   : > { %v6130_v3 = vpop.f32.mrf.mxu1 }
 0x157   : > { %v2249_v23 = vadd.f32 %v6129_v55, %v6089_v9  ;;  %v6091_v37 = vpop.f32.mrf.mxu0 }
 0x158   : > { %4845 = vmatmul.mubr.bf16.gmra.mxu1 %v4512_v10  ;;  %v6092_v14 = vadd.f32 %v6091_v37, %v6090_v32  ;;  %v6131_v13 = vpop.f32.mrf.mxu1 }
 0x159   : > { %4852 = vmatprep.mubr.bf16.mxu1 %v4522_v33  ;;  %v8703_v48 = vadd.f32 %v2249_v23, %v8617_v30  ;;  %v6132_v50 = vadd.f32 %v6131_v13, %v6130_v3  ;;  %v6093_v28 = vpop.f32.mrf.mxu0 }
 0x15a   : > { %v6133_v45 = vpop.f32.mrf.mxu1 }
 0x15b   : > { %4788 = vmatmul.mubr.bf16.gmra.mxu0 %v4516_v8  ;;  %v2254_v52 = vadd.f32 %v6132_v50, %v6092_v14  ;;  %v6094_v40 = vpop.f32.mrf.mxu0 }
 0x15c   : > { %v6095_v20 = vadd.f32 %v6094_v40, %v6093_v28  ;;  %v6134_v2 = vpop.f32.mrf.mxu1 }
 0x15d   : > { %v8707_v16 = vadd.f32 %v2254_v52, %v8629_v17  ;;  %v6135_v15 = vadd.f32 %v6134_v2, %v6133_v45  ;;  %v6096_v11 = vpop.f32.mrf.mxu0 }
 0x15e   : > { %v6136_v43 = vpop.f32.mrf.mxu1 }
 0x15f   : > { %v2257_v1 = vadd.f32 %v6135_v15, %v6095_v20  ;;  %v6097_v4 = vpop.f32.mrf.mxu0 }
 0x160   : > { %4853 = vmatmul.mubr.bf16.gmra.mxu1 %v4520_v42  ;;  %v6137_v54 = vpop.f32.mrf.mxu1  ;;  %v6098_v7 = vadd.f32 %v6097_v4, %v6096_v11 }
 0x161   : > { %v8710_v30 = vadd.f32 %v2257_v1, %v8644_v22  ;;  %v6138_v26 = vadd.f32 %v6137_v54, %v6136_v43  ;;  %v6099_v44 = vpop.f32.mrf.mxu0 }
 0x162   : > { %v6139_v49 = vpop.f32.mrf.mxu1 }
 0x163   : > { %v2262_v18 = vadd.f32 %v6138_v26, %v6098_v7  ;;  %v6100_v25 = vpop.f32.mrf.mxu0 }
 0x164   : > { %v6140_v51 = vpop.f32.mrf.mxu1  ;;  %v6101_v17 = vadd.f32 %v6100_v25, %v6099_v44 }
 0x165   : > { %v8713_v60 = vadd.f32 %v2262_v18, %v8658_v36  ;;  %v6141_v34 = vadd.f32 %v6140_v51, %v6139_v49  ;;  %v6102_v39 = vpop.f32.mrf.mxu0 }
 0x166   : > { %v6142_v62 = vpop.f32.mrf.mxu1 }
 0x167   : > { %v2265_v22 = vadd.f32 %v6141_v34, %v6101_v17  ;;  %v6103_v5 = vpop.f32.mrf.mxu0 }
 0x168   : > { %v6143_v31 = vpop.f32.mrf.mxu1  ;;  %v6104_v24 = vadd.f32 %v6103_v5, %v6102_v39 }
 0x169   : > { %v8716_v57 = vadd.f32 %v2265_v22, %v8674_v63  ;;  %v6144_v58 = vadd.f32 %v6143_v31, %v6142_v62  ;;  %v6105_v59 = vpop.f32.mrf.mxu0 }
 0x16a   : > { %v6145_v21 = vpop.f32.mrf.mxu1 }
 0x16b   : > { %v2270_v6 = vadd.f32 %v6144_v58, %v6104_v24  ;;  %v6106_v38 = vpop.f32.mrf.mxu0 }
 0x16c   : > { %v6146_v61 = vpop.f32.mrf.mxu1  ;;  %v6107_v19 = vadd.f32 %v6106_v38, %v6105_v59 }
 0x16d   : > { %v8719_v36 = vadd.f32 %v2270_v6, %v8688_v41  ;;  %v6147_v35 = vadd.f32 %v6146_v61, %v6145_v21  ;;  %v6164_v46 = vpop.f32.mrf.mxu0 }
 0x16e   : > { %v6204_v12 = vpop.f32.mrf.mxu1 }
 0x16f   : > { %v2273_v10 = vadd.f32 %v6147_v35, %v6107_v19  ;;  %v6165_v0 = vpop.f32.mrf.mxu0 }
 0x170   : > { %v6205_v53 = vpop.f32.mrf.mxu1  ;;  %v6166_v9 = vadd.f32 %v6165_v0, %v6164_v46 }
 0x171   : > { %v8722_v63 = vadd.f32 %v2273_v10, %v8693_v47  ;;  %v6206_v33 = vadd.f32 %v6205_v53, %v6204_v12  ;;  %v6167_v27 = vpop.f32.mrf.mxu0 }
 0x172   : > { %v6207_v55 = vpop.f32.mrf.mxu1 }
 0x173   : > { %v2709_v32 = vadd.f32 %v6206_v33, %v6166_v9  ;;  %v6168_v8 = vpop.f32.mrf.mxu0 }
 0x174   : > { %v6208_v29 = vpop.f32.mrf.mxu1  ;;  %v6169_v23 = vadd.f32 %v6168_v8, %v6167_v27 }
 0x175   : > { %v8725_v41 = vadd.f32 %v2709_v32, %v8699_v56  ;;  %v6209_v3 = vadd.f32 %v6208_v29, %v6207_v55  ;;  %v6170_v37 = vpop.f32.mrf.mxu0 }
 0x176   : > { %v6210_v14 = vpop.f32.mrf.mxu1 }
 0x177   : > { %v2712_v13 = vadd.f32 %v6209_v3, %v6169_v23  ;;  %v6171_v50 = vpop.f32.mrf.mxu0 }
 0x178   : > { %v6211_v28 = vpop.f32.mrf.mxu1  ;;  %v6172_v42 = vadd.f32 %v6171_v50, %v6170_v37 }
 0x179   : > { %v8728_v47 = vadd.f32 %v2712_v13, %v8703_v48  ;;  %v6212_v45 = vadd.f32 %v6211_v28, %v6210_v14  ;;  %v6173_v52 = vpop.f32.mrf.mxu0 }
 0x17a   : > { %v6213_v40 = vpop.f32.mrf.mxu1 }
 0x17b   : > { %v2717_v20 = vadd.f32 %v6212_v45, %v6172_v42  ;;  %v6174_v2 = vpop.f32.mrf.mxu0 }
 0x17c   : > { %v6214_v15 = vpop.f32.mrf.mxu1  ;;  %v6175_v1 = vadd.f32 %v6174_v2, %v6173_v52 }
 0x17d   : > { %v8731_v56 = vadd.f32 %v2717_v20, %v8707_v16  ;;  %v6215_v11 = vadd.f32 %v6214_v15, %v6213_v40  ;;  %v6176_v43 = vpop.f32.mrf.mxu0 }
 0x17e   : > { %v6216_v54 = vpop.f32.mrf.mxu1 }
 0x17f   : > { %v2720_v4 = vadd.f32 %v6215_v11, %v6175_v1  ;;  %v6177_v7 = vpop.f32.mrf.mxu0 }
 0x180   : > { %v6178_v48 = vadd.f32 %v6177_v7, %v6176_v43  ;;  %v6217_v44 = vpop.f32.mrf.mxu1 }
 0x181   : > { %v8734_v26 = vadd.f32 %v2720_v4, %v8710_v30  ;;  %v6218_v49 = vadd.f32 %v6217_v44, %v6216_v54  ;;  %v6179_v18 = vpop.f32.mrf.mxu0 }
 0x182   : > { %v6219_v25 = vpop.f32.mrf.mxu1 }
 0x183   : > { %v2725_v51 = vadd.f32 %v6218_v49, %v6178_v48  ;;  %v6180_v17 = vpop.f32.mrf.mxu0 }
 0x184   : > { %v6181_v34 = vadd.f32 %v6180_v17, %v6179_v18  ;;  %v6220_v39 = vpop.f32.mrf.mxu1 }
 0x185   : > { %v8737_v16 = vadd.f32 %v2725_v51, %v8713_v60  ;;  %v6221_v62 = vadd.f32 %v6220_v39, %v6219_v25  ;;  %v6182_v22 = vpop.f32.mrf.mxu0 }
 0x186   : > { %v6222_v5 = vpop.f32.mrf.mxu1 }
 0x187   : > { %v2728_v31 = vadd.f32 %v6221_v62, %v6181_v34  ;;  %v6183_v24 = vpop.f32.mrf.mxu0 }
 0x188   : > { %v6184_v58 = vadd.f32 %v6183_v24, %v6182_v22  ;;  %v6223_v30 = vpop.f32.mrf.mxu1 }
 0x189   : > { %v8740_v59 = vadd.f32 %v2728_v31, %v8716_v57  ;;  %v6224_v21 = vadd.f32 %v6223_v30, %v6222_v5  ;;  %v6185_v6 = vpop.f32.mrf.mxu0 }
 0x18a   : > { %v6225_v38 = vpop.f32.mrf.mxu1 }
 0x18b   : > { %v2733_v61 = vadd.f32 %v6224_v21, %v6184_v58  ;;  %v6186_v19 = vpop.f32.mrf.mxu0 }
 0x18c   : > { %v6187_v35 = vadd.f32 %v6186_v19, %v6185_v6  ;;  %v6226_v46 = vpop.f32.mrf.mxu1 }
 0x18d   : > { %v8743_v60 = vadd.f32 %v2733_v61, %v8719_v36  ;;  %v6227_v12 = vadd.f32 %v6226_v46, %v6225_v38  ;;  %v6244_v10 = vpop.f32.mrf.mxu0 }
 0x18e   : > { %v6284_v0 = vpop.f32.mrf.mxu1 }
 0x18f   : > { %v2736_v53 = vadd.f32 %v6227_v12, %v6187_v35  ;;  %v6245_v9 = vpop.f32.mrf.mxu0 }
 0x190   : > { %v6246_v33 = vadd.f32 %v6245_v9, %v6244_v10  ;;  %v6285_v27 = vpop.f32.mrf.mxu1 }
 0x191   : > { %v2746_v57 = vadd.f32 %v2736_v53, %v8722_v63  ;;  %v6286_v55 = vadd.f32 %v6285_v27, %v6284_v0  ;;  %v6247_v32 = vpop.f32.mrf.mxu0 }
 0x192   : > { %v6287_v8 = vpop.f32.mrf.mxu1 }
 0x193   : > { %v3221_v29 = vadd.f32 %v6286_v55, %v6246_v33  ;;  %v6248_v23 = vpop.f32.mrf.mxu0 }
 0x194   : > { %v6249_v3 = vadd.f32 %v6248_v23, %v6247_v32  ;;  %v6288_v37 = vpop.f32.mrf.mxu1 }
 0x195   : > { %v8747_v14 = vadd.f32 %v3221_v29, %v8725_v41  ;;  %v6289_v36 = vadd.f32 %v6288_v37, %v6287_v8  ;;  %v6250_v13 = vpop.f32.mrf.mxu0 }
 0x196   : > { %v6290_v50 = vpop.f32.mrf.mxu1 }
 0x197   : > { %v3224_v28 = vadd.f32 %v6289_v36, %v6249_v3  ;;  %v6251_v42 = vpop.f32.mrf.mxu0 }
 0x198   : > { %v6252_v45 = vadd.f32 %v6251_v42, %v6250_v13  ;;  %v6291_v52 = vpop.f32.mrf.mxu1 }
 0x199   : > { %v8750_v40 = vadd.f32 %v3224_v28, %v8728_v47  ;;  %v6292_v63 = vadd.f32 %v6291_v52, %v6290_v50  ;;  %v6253_v20 = vpop.f32.mrf.mxu0 }
 0x19a   : > { %v6293_v2 = vpop.f32.mrf.mxu1 }
 0x19b   : > { %v3229_v15 = vadd.f32 %v6292_v63, %v6252_v45  ;;  %v6254_v1 = vpop.f32.mrf.mxu0 }
 0x19c   : > { %v6255_v11 = vadd.f32 %v6254_v1, %v6253_v20  ;;  %v6294_v43 = vpop.f32.mrf.mxu1 }
 0x19d   : > { %v8753_v41 = vadd.f32 %v3229_v15, %v8731_v56  ;;  %v6295_v4 = vadd.f32 %v6294_v43, %v6293_v2  ;;  %v6256_v54 = vpop.f32.mrf.mxu0 }
 0x19e   : > { %v6296_v7 = vpop.f32.mrf.mxu1 }
 0x19f   : > { %v3232_v48 = vadd.f32 %v6295_v4, %v6255_v11  ;;  %v6257_v44 = vpop.f32.mrf.mxu0 }
 0x1a0   : > { %v6258_v49 = vadd.f32 %v6257_v44, %v6256_v54  ;;  %v6297_v18 = vpop.f32.mrf.mxu1 }
 0x1a1   : > { %v8756_v47 = vadd.f32 %v3232_v48, %v8734_v26  ;;  %v6298_v25 = vadd.f32 %v6297_v18, %v6296_v7  ;;  %v6259_v51 = vpop.f32.mrf.mxu0 }
 0x1a2   : > { %v6299_v17 = vpop.f32.mrf.mxu1 }
 0x1a3   : > { %v3237_v34 = vadd.f32 %v6298_v25, %v6258_v49  ;;  %v6260_v39 = vpop.f32.mrf.mxu0 }
 0x1a4   : > { %v6261_v62 = vadd.f32 %v6260_v39, %v6259_v51  ;;  %v6300_v22 = vpop.f32.mrf.mxu1 }
 0x1a5   : > { %v8759_v56 = vadd.f32 %v3237_v34, %v8737_v16  ;;  %v6301_v5 = vadd.f32 %v6300_v22, %v6299_v17  ;;  %v6262_v31 = vpop.f32.mrf.mxu0 }
 0x1a6   : > { %v6302_v24 = vpop.f32.mrf.mxu1 }
 0x1a7   : > { %8933 = vst [vmem:[#allocation2_spill] sm:$0xff] %v8759_v56  ;;  %v3240_v58 = vadd.f32 %v6301_v5, %v6261_v62  ;;  %v6263_v30 = vpop.f32.mrf.mxu0 }
 0x1a8   : > { %v6264_v21 = vadd.f32 %v6263_v30, %v6262_v31  ;;  %v6303_v6 = vpop.f32.mrf.mxu1 }
 0x1a9   : > { %v8762_v26 = vadd.f32 %v3240_v58, %v8740_v59  ;;  %v6304_v38 = vadd.f32 %v6303_v6, %v6302_v24  ;;  %v6265_v61 = vpop.f32.mrf.mxu0 }
 0x1aa   : > { %v6305_v19 = vpop.f32.mrf.mxu1 }
 0x1ab   : > { %8934 = vst [vmem:[#allocation3_spill] sm:$0xff] %v8762_v26  ;;  %v3245_v35 = vadd.f32 %v6304_v38, %v6264_v21  ;;  %v6266_v46 = vpop.f32.mrf.mxu0 }
 0x1ac   : > { %v6267_v12 = vadd.f32 %v6266_v46, %v6265_v61  ;;  %v6306_v10 = vpop.f32.mrf.mxu1 }
 0x1ad   : > { %v8765_v16 = vadd.f32 %v3245_v35, %v8743_v60  ;;  %v6307_v0 = vadd.f32 %v6306_v10, %v6305_v19 }
 0x1af   : > { %8935 = vst [vmem:[#allocation4_spill] sm:$0xff] %v8765_v16  ;;  %v3248_v53 = vadd.f32 %v6307_v0, %v6267_v12 }
 0x1b1   : > { %v8769_v33 = vadd.f32 %v3248_v53, %v2746_v57 }
 0x1b3   : > { %v8767_v9 = vpop.f32.mrf.mxu0  ;;  %8936 = vst [vmem:[#allocation5_spill] sm:$0xff] %v8769_v33 }
 0x1b5   : > { %v6325_v27 = vpop.f32.mrf.mxu0 }
 0x1b6   : > { %v6326_v56 = vadd.f32 %v6325_v27, %v8767_v9 }
 0x1b7   : > { %v6364_v55 = vpop.f32.mrf.mxu1  ;;  %v8771_v32 = vpop.f32.mrf.mxu0 }
 0x1b9   : > { %v6365_v59 = vpop.f32.mrf.mxu1  ;;  %v8775_v29 = vpop.f32.mrf.mxu0 }
 0x1bb   : > { %v8773_v8 = vpop.f32.mrf.mxu1 }
 0x1bd   : > { %v8777_v23 = vpop.f32.mrf.mxu1 }
 0x1c5   : > { %v8779_v3 = vpop.f32.mrf.mxu0 }
 0x1c6   : > { %v8781_v60 = vpop.f32.mrf.mxu1 }
 0x1c7   : > { %v8783_v37 = vpop.f32.mrf.mxu0 }
 0x1c8   : > { %v8785_v36 = vpop.f32.mrf.mxu1 }
 0x1c9   : > { %v8787_v57 = vpop.f32.mrf.mxu0 }
 0x1ca   : > { %v8789_v13 = vpop.f32.mrf.mxu1 }
 0x1cb   : > { %v8791_v50 = vpop.f32.mrf.mxu0 }
 0x1cc   : > { %v8793_v28 = vpop.f32.mrf.mxu1 }
 0x1d2   : > { %v8795_v42 = vpop.f32.mrf.mxu0  ;;  %v8797_v45 = vpop.f32.mrf.mxu1 }
 0x1d4   : > { %v8799_v52 = vpop.f32.mrf.mxu0  ;;  %v8801_v63 = vpop.f32.mrf.mxu1 }
 0x1d6   : > { %v8803_v20 = vpop.f32.mrf.mxu0  ;;  %v8805_v2 = vpop.f32.mrf.mxu1 }
 0x1d8   : > { %v8807_v15 = vpop.f32.mrf.mxu0  ;;  %v8809_v1 = vpop.f32.mrf.mxu1 }
 0x1da   : > { %v8811_v11 = vpop.f32.mrf.mxu0  ;;  %v8813_v43 = vpop.f32.mrf.mxu1 }
 0x1db   : > { %8937 = vst [vmem:[#allocation6_spill] sm:$0xff] %v8811_v11  ;;  %8938 = vst [vmem:[#allocation7_spill] sm:$0xff] %v8813_v43 }
 0x1dc   : > { %v8815_v4 = vpop.f32.mrf.mxu0  ;;  %v8817_v54 = vpop.f32.mrf.mxu1 }
 0x1dd   : > { %8939 = vst [vmem:[#allocation8_spill] sm:$0xff] %v8815_v4  ;;  %8940 = vst [vmem:[#allocation9_spill] sm:$0xff] %v8817_v54  ;;  %v6366_v54 = vadd.f32 %v6365_v59, %v6364_v55  ;;  %v6332_v55 = vadd.f32 %v8783_v37, %v8779_v3  ;;  %v6372_v59 = vadd.f32 %v8785_v36, %v8781_v60 }
 0x1de   : > { %v8819_v7 = vpop.f32.mrf.mxu0  ;;  %v8821_v48 = vpop.f32.mrf.mxu1  ;;  %v6335_v3 = vadd.f32 %v8791_v50, %v8787_v57  ;;  %v6375_v60 = vadd.f32 %v8793_v28, %v8789_v13 }
 0x1df   : > { %8941 = vst [vmem:[#allocation10_spill] sm:$0xff] %v8819_v7  ;;  %8942 = vst [vmem:[#allocation11_spill] sm:$0xff] %v8821_v48 }
 0x1e0   : > { %v8823_v44 = vpop.f32.mrf.mxu0  ;;  %v8825_v49 = vpop.f32.mrf.mxu1 }
 0x1e1   : > { %8943 = vst [vmem:[#allocation12_spill] sm:$0xff] %v8823_v44  ;;  %8944 = vst [vmem:[#allocation13_spill] sm:$0xff] %v8825_v49 }
 0x1e2   : > { %v6404_v18 = vpop.f32.mrf.mxu0  ;;  %v6444_v25 = vpop.f32.mrf.mxu1 }
 0x1e4   : > { %v6405_v51 = vpop.f32.mrf.mxu0  ;;  %v6445_v17 = vpop.f32.mrf.mxu1 }
 0x1e5   : > { %v6406_v11 = vadd.f32 %v6405_v51, %v6404_v18 }
 0x1e6   : > { %v6407_v34 = vpop.f32.mrf.mxu0  ;;  %v6447_v39 = vpop.f32.mrf.mxu1 }
 0x1e8   : > { %v6408_v62 = vpop.f32.mrf.mxu0  ;;  %v6448_v22 = vpop.f32.mrf.mxu1 }
 0x1e9   : > { %v6449_v9 = vadd.f32 %v6448_v22, %v6447_v39 }
 0x1ea   : > { %v6410_v5 = vpop.f32.mrf.mxu0  ;;  %v6450_v31 = vpop.f32.mrf.mxu1 }
 0x1ec   : > { %v6411_v24 = vpop.f32.mrf.mxu0  ;;  %v6451_v58 = vpop.f32.mrf.mxu1 }
 0x1ee   : > { %v6413_v30 = vpop.f32.mrf.mxu0  ;;  %v6453_v21 = vpop.f32.mrf.mxu1 }
 0x1f0   : > { %v6414_v6 = vpop.f32.mrf.mxu0  ;;  %v6454_v38 = vpop.f32.mrf.mxu1 }
 0x1f3   : > { %v8827_v61 = vpop.f32.mrf.mxu0  ;;  %v8829_v19 = vpop.f32.mrf.mxu1 }
 0x1f5   : > { %v8831_v35 = vpop.f32.mrf.mxu0  ;;  %v8833_v46 = vpop.f32.mrf.mxu1 }
 0x1f7   : > { %v8835_v12 = vpop.f32.mrf.mxu0  ;;  %v8837_v10 = vpop.f32.mrf.mxu1 }
 0x1f8   : > { %8945 = vst [vmem:[#allocation14_spill] sm:$0xff] %v8837_v10  ;;  %v6409_v10 = vadd.f32 %v6408_v62, %v6407_v34  ;;  %v3748_v34 = vadd.f32 %v6372_v59, %v6332_v55  ;;  %v3751_v62 = vadd.f32 %v6375_v60, %v6335_v3 }
 0x1f9   : > { %v8839_v0 = vpop.f32.mrf.mxu0  ;;  %v8841_v53 = vpop.f32.mrf.mxu1 }
 0x1fa   : > { %8946 = vst [vmem:[#allocation15_spill] sm:$0xff] %v8841_v53  ;;  %v4294_v51 = vadd.f32 %v6449_v9, %v6409_v10  ;;  %v3772_v39 = vadd.f32 %v3748_v34, %v8753_v41  ;;  %v6418_v10 = vadd.f32 %v8831_v35, %v8827_v61  ;;  %v6458_v41 = vadd.f32 %v8833_v46, %v8829_v19 }
 0x1fb   : > { %v8843_v33 = vpop.f32.mrf.mxu0  ;;  %v8845_v16 = vpop.f32.mrf.mxu1  ;;  %v6421_v19 = vadd.f32 %v8839_v0, %v8835_v12  ;;  %v8960_v0 = vld [vmem:[#allocation2_spill] sm:$0xff] }
 0x1fc   : > { %8947 = vst [vmem:[#allocation16_spill] sm:$0xff] %v8843_v33  ;;  %8948 = vst [vmem:[#allocation17_spill] sm:$0xff] %v8845_v16  ;;  %v6446_v33 = vadd.f32 %v6445_v17, %v6444_v25  ;;  %v3740_v16 = vadd.f32 %v6366_v54, %v6326_v56 }
 0x1fd   : > { %v8847_v49 = vpop.f32.mrf.mxu0  ;;  %v8849_v48 = vpop.f32.mrf.mxu1 }
 0x1fe   : > { %8949 = vst [vmem:[#allocation18_spill] sm:$0xff] %v8847_v49  ;;  %8950 = vst [vmem:[#allocation19_spill] sm:$0xff] %v8849_v48  ;;  %v6329_v48 = vadd.f32 %v8775_v29, %v8771_v32  ;;  %v3770_v54 = vadd.f32 %v3740_v16, %v8747_v14 }
 0x1ff   : > { %v8851_v44 = vpop.f32.mrf.mxu0  ;;  %v8853_v7 = vpop.f32.mrf.mxu1  ;;  %v8954_v35 = vld [vmem:[#allocation14_spill] sm:$0xff] }
 0x200   : > { %8951 = vst [vmem:[#allocation20_spill] sm:$0xff] %v8851_v44  ;;  %8952 = vst [vmem:[#allocation21_spill] sm:$0xff] %v8853_v7  ;;  %v6369_v44 = vadd.f32 %v8777_v23, %v8773_v8  ;;  %v6412_v8 = vadd.f32 %v6411_v24, %v6410_v5  ;;  %v6452_v23 = vadd.f32 %v6451_v58, %v6450_v31 }
 0x201   : > { %v8855_v26 = vpop.f32.mrf.mxu0  ;;  %v8858_v43 = vpop.f32.mrf.mxu1  ;;  %v6378_v31 = vadd.f32 %v8801_v63, %v8797_v45  ;;  %v6381_v45 = vadd.f32 %v8809_v1, %v8805_v2  ;;  %v8955_v46 = vld [vmem:[#allocation15_spill] sm:$0xff] }
 0x202   : > { %8953 = vst [vmem:[#allocation22_spill] sm:$0xff] %v8855_v26  ;;  %v4291_v26 = vadd.f32 %v6446_v33, %v6406_v11  ;;  %v3743_v32 = vadd.f32 %v6369_v44, %v6329_v48  ;;  %v6415_v48 = vadd.f32 %v6414_v6, %v6413_v30  ;;  %v6455_v44 = vadd.f32 %v6454_v38, %v6453_v21 }
 0x203   : > { %v6484_v4 = vpop.f32.mrf.mxu0  ;;  %v8961_v3 = vld [vmem:[#allocation16_spill] sm:$0xff] }
 0x204   : > { %v4321_v11 = vadd.f32 %v4291_v26, %v3770_v54  ;;  %v3771_v26 = vadd.f32 %v3743_v32, %v8750_v40  ;;  %v6338_v40 = vadd.f32 %v8799_v52, %v8795_v42  ;;  %v4302_v21 = vadd.f32 %v6455_v44, %v6415_v48 }
 0x205   : > { %v6485_v53 = vpop.f32.mrf.mxu0  ;;  %v6341_v42 = vadd.f32 %v8807_v15, %v8803_v20  ;;  %v4307_v20 = vadd.f32 %v6458_v41, %v6418_v10  ;;  %v8962_v60 = vld [vmem:[#allocation18_spill] sm:$0xff] }
 0x206   : > { %v6486_v27 = vadd.f32 %v6485_v53, %v6484_v4  ;;  %v4322_v50 = vadd.f32 %v4294_v51, %v3771_v26  ;;  %v3756_v55 = vadd.f32 %v6378_v31, %v6338_v40  ;;  %v8964_v26 = vld [vmem:[#allocation19_spill] sm:$0xff]  ;;  %v8969_v31 = vld [vmem:[#allocation13_spill] sm:$0xff] }
 0x207   : > { %v6487_v49 = vpop.f32.mrf.mxu0  ;;  %v3759_v1 = vadd.f32 %v6381_v45, %v6341_v42  ;;  %v8968_v40 = vld [vmem:[#allocation11_spill] sm:$0xff]  ;;  %v8970_v41 = vld [vmem:[#allocation20_spill] sm:$0xff]  ;;  %v8972_v42 = vld [vmem:[#allocation21_spill] sm:$0xff] }
 0x208   : > { %v6524_v7 = vpop.f32.mrf.mxu1  ;;  %v3774_v51 = vadd.f32 %v3756_v55, %v8960_v0  ;;  %v6467_v45 = vadd.f32 %v8858_v43, %v8972_v42  ;;  %v8974_v43 = vld [vmem:[#allocation5_spill] sm:$0xff] }
 0x209   : > { %v6488_v56 = vpop.f32.mrf.mxu0 }
 0x20a   : > { %v6525_v18 = vpop.f32.mrf.mxu1  ;;  %v6489_v17 = vadd.f32 %v6488_v56, %v6487_v49  ;;  %v4325_v48 = vadd.f32 %v4307_v20, %v3774_v51 }
 0x20b   : > { %v6526_v29 = vadd.f32 %v6525_v18, %v6524_v7  ;;  %v6490_v33 = vpop.f32.mrf.mxu0  ;;  %v4299_v7 = vadd.f32 %v6452_v23, %v6412_v8  ;;  %v6461_v18 = vadd.f32 %v8955_v46, %v8954_v35  ;;  %v8958_v23 = vld [vmem:[#allocation7_spill] sm:$0xff] }
 0x20c   : > { %v6527_v25 = vpop.f32.mrf.mxu1 }
 0x20d   : > { %v4831_v4 = vadd.f32 %v6526_v29, %v6486_v27  ;;  %v6491_v16 = vpop.f32.mrf.mxu0  ;;  %v4323_v30 = vadd.f32 %v4299_v7, %v3772_v39  ;;  %v3773_v27 = vadd.f32 %v3751_v62, %v8756_v47  ;;  %v8956_v29 = vld [vmem:[#allocation6_spill] sm:$0xff]  ;;  %v8957_v47 = vld [vmem:[#allocation8_spill] sm:$0xff]  ;;  %v4310_v34 = vadd.f32 %v6461_v18, %v6421_v19 }
 0x20e   : > { %v6528_v14 = vpop.f32.mrf.mxu1  ;;  %v6492_v28 = vadd.f32 %v6491_v16, %v6490_v33  ;;  %v6344_v8 = vadd.f32 %v8957_v47, %v8956_v29  ;;  %v8963_v16 = vld [vmem:[#allocation17_spill] sm:$0xff]  ;;  %v8966_v62 = vld [vmem:[#allocation10_spill] sm:$0xff] }
 0x20f   : > { %v4861_v37 = vadd.f32 %v4831_v4, %v4321_v11  ;;  %v6529_v36 = vadd.f32 %v6528_v14, %v6527_v25  ;;  %v6493_v57 = vpop.f32.mrf.mxu0  ;;  %v4324_v32 = vadd.f32 %v4302_v21, %v3773_v27  ;;  %v8959_v25 = vld [vmem:[#allocation9_spill] sm:$0xff]  ;;  %v6424_v14 = vadd.f32 %v8962_v60, %v8961_v3 }
 0x210   : > { %v6530_v49 = vpop.f32.mrf.mxu1  ;;  %v6384_v33 = vadd.f32 %v8959_v25, %v8958_v23 }
 0x211   : > { %4869 = vst [vmem:[%s8877_s13] sm:$0xff] %v4861_v37  ;;  %v4834_v13 = vadd.f32 %v6529_v36, %v6489_v17  ;;  %v6494_v5 = vpop.f32.mrf.mxu0  ;;  %v6464_v37 = vadd.f32 %v8964_v26, %v8963_v16 }
 0x212   : > { %v6531_v22 = vpop.f32.mrf.mxu1  ;;  %v6495_v9 = vadd.f32 %v6494_v5, %v6493_v57  ;;  %v8965_v57 = vld [vmem:[#allocation3_spill] sm:$0xff] }
 0x213   : > { %v4862_v24 = vadd.f32 %v4834_v13, %v4322_v50  ;;  %v6532_v58 = vadd.f32 %v6531_v22, %v6530_v49  ;;  %v6496_v38 = vpop.f32.mrf.mxu0  ;;  %v3775_v50 = vadd.f32 %v3759_v1, %v8965_v57  ;;  %v3764_v13 = vadd.f32 %v6384_v33, %v6344_v8  ;;  %v8967_v22 = vld [vmem:[#allocation12_spill] sm:$0xff] }
 0x214   : > { %v6533_v6 = vpop.f32.mrf.mxu1  ;;  %v6347_v5 = vadd.f32 %v8967_v22, %v8966_v62 }
 0x215   : > { %4870 = vst [vmem:[%s8877_s13 + $0x8] sm:$0xff] %v4862_v24  ;;  %v4839_v53 = vadd.f32 %v6532_v58, %v6492_v28  ;;  %v6497_v63 = vpop.f32.mrf.mxu0  ;;  %v6387_v24 = vadd.f32 %v8969_v31, %v8968_v40  ;;  %v4326_v21 = vadd.f32 %v4310_v34, %v3775_v50 }
 0x216   : > { %v6534_v52 = vpop.f32.mrf.mxu1  ;;  %v6498_v2 = vadd.f32 %v6497_v63, %v6496_v38 }
 0x217   : > { %v4863_v59 = vadd.f32 %v4839_v53, %v4323_v30  ;;  %v6535_v61 = vadd.f32 %v6534_v52, %v6533_v6  ;;  %v6499_v54 = vpop.f32.mrf.mxu0  ;;  %v4315_v6 = vadd.f32 %v6464_v37, %v6424_v14  ;;  %v8971_v53 = vld [vmem:[#allocation22_spill] sm:$0xff]  ;;  %v3767_v19 = vadd.f32 %v6387_v24, %v6347_v5 }
 0x218   : > { %v6536_v56 = vpop.f32.mrf.mxu1 }
 0x219   : > { %4871 = vst [vmem:[%s8877_s13 + $0x10] sm:$0xff] %v4863_v59  ;;  %v4842_v15 = vadd.f32 %v6535_v61, %v6495_v9  ;;  %v6500_v12 = vpop.f32.mrf.mxu0  ;;  %v6427_v9 = vadd.f32 %v8971_v53, %v8970_v41  ;;  %v8973_v59 = vld [vmem:[#allocation4_spill] sm:$0xff] }
 0x21a   : > { %v6537_v11 = vpop.f32.mrf.mxu1  ;;  %v6501_v49 = vadd.f32 %v6500_v12, %v6499_v54  ;;  %v3776_v61 = vadd.f32 %v3764_v13, %v8973_v59 }
 0x21b   : > { %v4864_v4 = vadd.f32 %v4842_v15, %v4324_v32  ;;  %v6538_v17 = vadd.f32 %v6537_v11, %v6536_v56  ;;  %v6502_v7 = vpop.f32.mrf.mxu0  ;;  %v4318_v54 = vadd.f32 %v6467_v45, %v6427_v9 }
 0x21c   : > { %v6539_v36 = vpop.f32.mrf.mxu1  ;;  %v4327_v56 = vadd.f32 %v4315_v6, %v3776_v61 }
 0x21d   : > { %4872 = vst [vmem:[%s8877_s13 + $0x18] sm:$0xff] %v4864_v4  ;;  %v4847_v44 = vadd.f32 %v6538_v17, %v6498_v2  ;;  %v6503_v39 = vpop.f32.mrf.mxu0  ;;  %v3777_v2 = vadd.f32 %v3767_v19, %v8974_v43 }
 0x21e   : > { %v6540_v28 = vpop.f32.mrf.mxu1  ;;  %v6504_v63 = vadd.f32 %v6503_v39, %v6502_v7 }
 0x21f   : > { %v4865_v58 = vadd.f32 %v4847_v44, %v4325_v48  ;;  %v6541_v30 = vadd.f32 %v6540_v28, %v6539_v36  ;;  %v6505_v10 = vpop.f32.mrf.mxu0  ;;  %v4328_v47 = vadd.f32 %v4318_v54, %v3777_v2 }
 0x220   : > { %v6542_v38 = vpop.f32.mrf.mxu1 }
 0x221   : > { %4873 = vst [vmem:[%s8877_s13 + $0x20] sm:$0xff] %v4865_v58  ;;  %v4850_v52 = vadd.f32 %v6541_v30, %v6501_v49  ;;  %v6506_v55 = vpop.f32.mrf.mxu0 }
 0x222   : > { %v6543_v27 = vpop.f32.mrf.mxu1  ;;  %v6507_v20 = vadd.f32 %v6506_v55, %v6505_v10 }
 0x223   : > { %v4866_v35 = vadd.f32 %v4850_v52, %v4326_v21  ;;  %v6544_v46 = vadd.f32 %v6543_v27, %v6542_v38 }
 0x224   : > { %v6545_v18 = vpop.f32.mrf.mxu1 }
 0x225   : > { %4874 = vst [vmem:[%s8877_s13 + $0x28] sm:$0xff] %v4866_v35  ;;  %v4855_v32 = vadd.f32 %v6544_v46, %v6504_v63 }
 0x226   : > { %v6546_v15 = vpop.f32.mrf.mxu1 }
 0x227   : > { %v4867_v1 = vadd.f32 %v4855_v32, %v4327_v56  ;;  %v6547_v29 = vadd.f32 %v6546_v15, %v6545_v18 }
 0x229   : > { %4875 = vst [vmem:[%s8877_s13 + $0x30] sm:$0xff] %v4867_v1  ;;  %v4858_v8 = vadd.f32 %v6547_v29, %v6507_v20 }
 0x22b   : > { %v4868_v23 = vadd.f32 %v4858_v8, %v4328_v47 }
 0x22d   : > { %4876 = vst [vmem:[%s8877_s13 + $0x38] sm:$0x1f] %v4868_v23 }
 0x22e PF: > { %s13_s12 = sadd.s32 1, %s6951_s12  }
 0x22f   : > { %p10_p4 = scmp.ge.s32.totalorder %s13_s12, 4  }
 0x231   :  { %12 = sbr.rel (!%p10_p4) target bundleno = 1 (0x1), region = 70 }

</bundles_post_ra>
